<compile_context>
chip_gen: v7x
topology: tpu7x:2x2x1
jax: 0.10.0
libtpu: 0.0.40
codegen_flags: <defaults>
</compile_context>

<pallas_src>
import jax
import jax.numpy as jnp
from jax.experimental import pallas as pl
from jax.experimental.pallas import tpu as pltpu
import numpy as np

HIDDEN = 64
INPUT_SIZE = 1


def lstm_kernel(x_ref, wih0_ref, b0_ref, whh0_ref, wih1_ref, whh1_ref,
                b1_ref, fcw_ref, fcb_ref, out_ref):
    H = HIDDEN
    T, BG, _ = x_ref.shape

    # ---- hoist all loop-invariant VMEM reads / broadcasts -----------------
    wih0 = wih0_ref[...]                                   # (1, 4H)  f32
    b0 = b0_ref[...]                                       # (1, 4H)  f32
    whh0 = whh0_ref[...]                                   # (H, 4H)  bf16
    wih1 = wih1_ref[...]                                   # (H, 4H)  bf16
    whh1 = whh1_ref[...]                                   # (H, 4H)  bf16
    # JAX does not CSE broadcast_in_dim -> broadcast b1 once here.
    b1b = jnp.broadcast_to(b1_ref[...], (BG, 4 * H))       # (BG, 4H) f32

    zeros = jnp.zeros((BG, H), jnp.float32)
    h0, c0, h1, c1 = zeros, zeros, zeros, zeros
    # bf16 copies of the hidden state used as MXU LHS (one cast per step,
    # reused by the following step's recurrent matmul).
    h0b = jnp.zeros((BG, H), jnp.bfloat16)
    h1b = jnp.zeros((BG, H), jnp.bfloat16)

    def cell(z, c):
        # gate column order is [i, f, o, g]: one sigmoid push + one tanh push.
        sig = jax.nn.sigmoid(z[:, :3 * H])
        g = jnp.tanh(z[:, 3 * H:])
        i_g = sig[:, :H]
        f_g = sig[:, H:2 * H]
        o_g = sig[:, 2 * H:3 * H]
        c_new = f_g * c + i_g * g
        h_new = o_g * jnp.tanh(c_new)
        return h_new, c_new

    # Statically unrolled recurrence (T small, known at trace time).  The
    # h1@whh1 product at step t depends only on h1[t-1], so the scheduler can
    # overlap it with layer-0's cell() EUP/VPU work.
    for t in range(T):
        # layer 0: input projection (I == 1) is a per-step broadcast multiply;
        # only the recurrent matmul is left on the serial path.
        z0 = (x_ref[t] * wih0 + b0
              + jnp.dot(h0b, whh0, preferred_element_type=jnp.float32))
        h0, c0 = cell(z0, c0)
        h0b = h0.astype(jnp.bfloat16)

        # layer 1: two separate matmuls (no lane concat).
        z1 = (jnp.dot(h0b, wih1, preferred_element_type=jnp.float32)
              + jnp.dot(h1b, whh1, preferred_element_type=jnp.float32)
              + b1b)
        h1, c1 = cell(z1, c1)
        h1b = h1.astype(jnp.bfloat16)

    # Final FC (64 -> 1): N=1, so VPU broadcast-multiply + lane reduction
    # instead of an MXU pass.  (One-time (BG,1) masked store; lane-dense
    # output only starts to matter once the per-group batch reaches 128.)
    out_ref[...] = (jnp.sum(h1 * fcw_ref[...], axis=-1, keepdims=True)
                    + fcb_ref[...])


def lstm_forward(x, packed, *, batch_group=8):
    """x: (B, T, I) float32; packed: kernel-layout params from pack_params."""
    B, T, I = x.shape
    assert I == INPUT_SIZE
    assert B % batch_group == 0, "pad the batch to a multiple of batch_group"
    BG = batch_group
    num_groups = B // BG
    H = HIDDEN

    x_tm = jnp.transpose(x, (1, 0, 2)).astype(jnp.float32)  # (T, B, I)

    def full_spec(a):
        zeros = (0,) * a.ndim
        return pl.BlockSpec(a.shape, lambda g: zeros)        # weights: whole array, invariant

    grid_spec = pltpu.PrefetchScalarGridSpec(
        num_scalar_prefetch=0,
        grid=(num_groups,),
        in_specs=[pl.BlockSpec((T, BG, I), lambda g: (0, g, 0))]
                 + [full_spec(a) for a in packed],
        out_specs=pl.BlockSpec((BG, 1), lambda g: (g, 0)),
    )

    # Advisory cost hint: the kernel is latency-bound, not flop/byte-bound.
    flops = 2 * 3 * B * T * H * (4 * H)
    transcendentals = 2 * 5 * B * T * H
    bytes_accessed = (int(x_tm.size) * 4
                      + sum(int(a.size) * a.dtype.itemsize for a in packed)
                      + B * 4)

    kernel = pl.pallas_call(
        lstm_kernel,
        out_shape=jax.ShapeDtypeStruct((B, 1), jnp.float32),
        grid_spec=grid_spec,
        compiler_params=pltpu.CompilerParams(
            dimension_semantics=("parallel",)),   # shard groups across v7x's 2 TCs
        cost_estimate=pl.CostEstimate(flops=flops,
                                      transcendentals=transcendentals,
                                      bytes_accessed=bytes_accessed),
    )
    return kernel(x_tm, *packed)


# ---------------------------------------------------------------------------
# Parameter construction (PyTorch layout, f32) + packing to the kernel layout.
# ---------------------------------------------------------------------------
def init_params(key, input_size=INPUT_SIZE, hidden=HIDDEN):
    """PyTorch-style U(-1/sqrt(H), 1/sqrt(H)) init, natural (4H, in) layout,
    gate row order [i, f, g, o] (as in nn.LSTM)."""
    bound = 1.0 / np.sqrt(hidden)
    ks = jax.random.split(key, 10)

    def u(k, shape):
        return jax.random.uniform(k, shape, jnp.float32, -bound, bound)

    return dict(
        w_ih0=u(ks[0], (4 * hidden, input_size)),
        w_hh0=u(ks[1], (4 * hidden, hidden)),
        b_ih0=u(ks[2], (4 * hidden,)),
        b_hh0=u(ks[3], (4 * hidden,)),
        w_ih1=u(ks[4], (4 * hidden, hidden)),
        w_hh1=u(ks[5], (4 * hidden, hidden)),
        b_ih1=u(ks[6], (4 * hidden,)),
        b_hh1=u(ks[7], (4 * hidden,)),
        fc_w=u(ks[8], (1, hidden)),   # Linear(64 -> 1): bound = 1/sqrt(64)
        fc_b=u(ks[9], (1,)),
    )


def _reorder_gates(w, hidden=HIDDEN):
    """PyTorch gate-block order [i, f, g, o] -> kernel order [i, f, o, g]."""
    i = w[0 * hidden:1 * hidden]
    f = w[1 * hidden:2 * hidden]
    g = w[2 * hidden:3 * hidden]
    o = w[3 * hidden:4 * hidden]
    return jnp.concatenate([i, f, o, g], axis=0)


def pack_params(p, hidden=HIDDEN):
    """Reorder gates, transpose to row-major x @ W layout; recurrent MXU
    weights in bf16 (f32 state/accumulation in the kernel)."""
    H = hidden
    wih0 = _reorder_gates(p["w_ih0"], H).T                              # (I, 4H)  f32
    b0 = _reorder_gates(p["b_ih0"] + p["b_hh0"], H).reshape(1, 4 * H)   # (1, 4H)  f32
    whh0 = _reorder_gates(p["w_hh0"], H).T.astype(jnp.bfloat16)         # (H, 4H)  bf16
    wih1 = _reorder_gates(p["w_ih1"], H).T.astype(jnp.bfloat16)         # (H, 4H)  bf16
    whh1 = _reorder_gates(p["w_hh1"], H).T.astype(jnp.bfloat16)         # (H, 4H)  bf16
    b1 = _reorder_gates(p["b_ih1"] + p["b_hh1"], H).reshape(1, 4 * H)   # (1, 4H)  f32
    fcw = p["fc_w"].astype(jnp.float32)                                 # (1, H)   f32
    fcb = p["fc_b"].reshape(1, 1).astype(jnp.float32)                   # (1, 1)   f32
    return (wih0, b0, whh0, wih1, whh1, b1, fcw, fcb)


# ---------------------------------------------------------------------------
# Pure-JAX f32 reference with PyTorch semantics (gate order i, f, g, o).
# ---------------------------------------------------------------------------
def lstm_ref(x, p, hidden=HIDDEN):
    H = hidden
    B, T, _ = x.shape

    def cell(x_t, h, c, w_ih, w_hh, b_ih, b_hh):
        z = x_t @ w_ih.T + h @ w_hh.T + b_ih + b_hh
        i = jax.nn.sigmoid(z[:, 0:H])
        f = jax.nn.sigmoid(z[:, H:2 * H])
        g = jnp.tanh(z[:, 2 * H:3 * H])
        o = jax.nn.sigmoid(z[:, 3 * H:4 * H])
        c_new = f * c + i * g
        h_new = o * jnp.tanh(c_new)
        return h_new, c_new

    h0 = c0 = h1 = c1 = jnp.zeros((B, H), jnp.float32)
    for t in range(T):
        h0, c0 = cell(x[:, t, :], h0, c0,
                      p["w_ih0"], p["w_hh0"], p["b_ih0"], p["b_hh0"])
        h1, c1 = cell(h0, h1, c1,
                      p["w_ih1"], p["w_hh1"], p["b_ih1"], p["b_hh1"])
    return h1 @ p["fc_w"].T + p["fc_b"]


if __name__ == "__main__":
    key = jax.random.PRNGKey(0)
    k_x, k_p = jax.random.split(key)

    # 16 independent sequences, split into 2 sublane-filling groups of 8
    # (exercises the parallel grid axis; both TensorCores busy on v7x).
    B, T, I = 16, 8, INPUT_SIZE
    x = jax.random.normal(k_x, (B, T, I), jnp.float32)

    params = init_params(k_p)
    packed = pack_params(params)

    out = lstm_forward(x, packed, batch_group=8)
    out = jax.block_until_ready(out)

    ref = lstm_ref(x, params)
    # Recurrent matmuls use bf16 MXU operands (f32 state + accumulation), so
    # the tolerance is looser than a pure-f32 path; rounding compounds over
    # 2 layers x 8 steps.
    np.testing.assert_allclose(np.asarray(out), np.asarray(ref),
                               rtol=3e-2, atol=3e-2)

    assert out.shape == (B, 1)
    print("KERNEL_OK")
</pallas_src>

<mosaic_0001>
module attributes {stable_mosaic.version = 11 : i64} {
  func.func @lstm_kernel(%arg0: i32, %arg1: memref<8x8x1xf32, #tpu.memory_space<vmem>>, %arg2: memref<1x256xf32, #tpu.memory_space<vmem>>, %arg3: memref<1x256xf32, #tpu.memory_space<vmem>>, %arg4: memref<64x256xbf16, #tpu.memory_space<vmem>>, %arg5: memref<64x256xbf16, #tpu.memory_space<vmem>>, %arg6: memref<64x256xbf16, #tpu.memory_space<vmem>>, %arg7: memref<1x256xf32, #tpu.memory_space<vmem>>, %arg8: memref<1x64xf32, #tpu.memory_space<vmem>>, %arg9: memref<1x1xf32, #tpu.memory_space<vmem>>, %arg10: memref<8x1xf32, #tpu.memory_space<vmem>>) attributes {dimension_semantics = [#tpu.dimension_semantics<parallel>], iteration_bounds = array<i64: 2>, scalar_prefetch = 0 : i64, scratch_operands = 0 : i64, tpu.core_type = #tpu.core_type<tc>, window_params = [{transform_indices = @transform_0, window_bounds = array<i64: 8, 8, 1>}, {pipeline_mode = #tpu.pipeline_mode<synchronous>, transform_indices = @transform_1, window_bounds = array<i64: 1, 256>}, {pipeline_mode = #tpu.pipeline_mode<synchronous>, transform_indices = @transform_2, window_bounds = array<i64: 1, 256>}, {pipeline_mode = #tpu.pipeline_mode<synchronous>, transform_indices = @transform_3, window_bounds = array<i64: 64, 256>}, {pipeline_mode = #tpu.pipeline_mode<synchronous>, transform_indices = @transform_4, window_bounds = array<i64: 64, 256>}, {pipeline_mode = #tpu.pipeline_mode<synchronous>, transform_indices = @transform_5, window_bounds = array<i64: 64, 256>}, {pipeline_mode = #tpu.pipeline_mode<synchronous>, transform_indices = @transform_6, window_bounds = array<i64: 1, 256>}, {pipeline_mode = #tpu.pipeline_mode<synchronous>, transform_indices = @transform_7, window_bounds = array<i64: 1, 64>}, {pipeline_mode = #tpu.pipeline_mode<synchronous>, transform_indices = @transform_8, window_bounds = array<i64: 1, 1>}, {transform_indices = @transform_9, window_bounds = array<i64: 8, 1>}]} {
    %c0 = arith.constant 0 : index
    %c0_0 = arith.constant 0 : index
    %0 = vector.load %arg2[%c0, %c0_0] : memref<1x256xf32, #tpu.memory_space<vmem>>, vector<1x256xf32>
    %c0_1 = arith.constant 0 : index
    %c0_2 = arith.constant 0 : index
    %1 = vector.load %arg3[%c0_1, %c0_2] : memref<1x256xf32, #tpu.memory_space<vmem>>, vector<1x256xf32>
    %c0_3 = arith.constant 0 : index
    %c0_4 = arith.constant 0 : index
    %2 = vector.load %arg4[%c0_3, %c0_4] : memref<64x256xbf16, #tpu.memory_space<vmem>>, vector<64x256xbf16>
    %c0_5 = arith.constant 0 : index
    %c0_6 = arith.constant 0 : index
    %3 = vector.load %arg5[%c0_5, %c0_6] : memref<64x256xbf16, #tpu.memory_space<vmem>>, vector<64x256xbf16>
    %c0_7 = arith.constant 0 : index
    %c0_8 = arith.constant 0 : index
    %4 = vector.load %arg6[%c0_7, %c0_8] : memref<64x256xbf16, #tpu.memory_space<vmem>>, vector<64x256xbf16>
    %c0_9 = arith.constant 0 : index
    %c0_10 = arith.constant 0 : index
    %5 = vector.load %arg7[%c0_9, %c0_10] : memref<1x256xf32, #tpu.memory_space<vmem>>, vector<1x256xf32>
    %6 = vector.shape_cast %5 : vector<1x256xf32> to vector<1x256xf32>
    %7 = vector.broadcast %6 : vector<1x256xf32> to vector<8x256xf32>
    %cst = arith.constant 0.000000e+00 : f32
    %8 = vector.broadcast %cst : f32 to vector<8x64xf32>
    %cst_11 = arith.constant 0.000000e+00 : bf16
    %9 = vector.broadcast %cst_11 : bf16 to vector<8x64xbf16>
    %cst_12 = arith.constant 0.000000e+00 : bf16
    %10 = vector.broadcast %cst_12 : bf16 to vector<8x64xbf16>
    %c0_13 = arith.constant 0 : index
    %c0_14 = arith.constant 0 : index
    %c0_15 = arith.constant 0 : index
    %11 = vector.load %arg1[%c0_13, %c0_14, %c0_15] : memref<8x8x1xf32, #tpu.memory_space<vmem>>, vector<1x8x1xf32>
    %12 = vector.shape_cast %11 : vector<1x8x1xf32> to vector<8x1xf32>
    %13 = vector.broadcast %12 : vector<8x1xf32> to vector<8x256xf32>
    %14 = vector.broadcast %0 : vector<1x256xf32> to vector<8x256xf32>
    %15 = arith.mulf %13, %14 : vector<8x256xf32>
    %16 = vector.broadcast %1 : vector<1x256xf32> to vector<8x256xf32>
    %17 = arith.addf %15, %16 : vector<8x256xf32>
    %cst_16 = arith.constant dense<0.000000e+00> : vector<8x256xf32>
    %18 = tpu.matmul %9, %2, %cst_16 {dimension_numbers = #tpu.dot_dimension_numbers<[1], [0], [0], [1], [0, 0, 1, 1], [], []>} : vector<8x64xbf16>, vector<64x256xbf16>, vector<8x256xf32> -> vector<8x256xf32>
    %19 = arith.addf %17, %18 : vector<8x256xf32>
    %20 = vector.extract_strided_slice %19 {offsets = [0, 0], sizes = [8, 192], strides = [1, 1]} : vector<8x256xf32> to vector<8x192xf32>
    %21 = arith.negf %20 : vector<8x192xf32>
    %22 = math.exp %21 : vector<8x192xf32>
    %cst_17 = arith.constant 1.000000e+00 : f32
    %23 = vector.broadcast %cst_17 : f32 to vector<8x192xf32>
    %24 = arith.addf %23, %22 : vector<8x192xf32>
    %25 = arith.divf %23, %24 : vector<8x192xf32>
    %26 = vector.extract_strided_slice %19 {offsets = [0, 192], sizes = [8, 64], strides = [1, 1]} : vector<8x256xf32> to vector<8x64xf32>
    %27 = math.tanh %26 : vector<8x64xf32>
    %28 = vector.extract_strided_slice %25 {offsets = [0, 0], sizes = [8, 64], strides = [1, 1]} : vector<8x192xf32> to vector<8x64xf32>
    %29 = vector.extract_strided_slice %25 {offsets = [0, 64], sizes = [8, 64], strides = [1, 1]} : vector<8x192xf32> to vector<8x64xf32>
    %30 = vector.extract_strided_slice %25 {offsets = [0, 128], sizes = [8, 64], strides = [1, 1]} : vector<8x192xf32> to vector<8x64xf32>
    %31 = arith.mulf %29, %8 : vector<8x64xf32>
    %32 = arith.mulf %28, %27 : vector<8x64xf32>
    %33 = arith.addf %31, %32 : vector<8x64xf32>
    %34 = math.tanh %33 : vector<8x64xf32>
    %35 = arith.mulf %30, %34 : vector<8x64xf32>
    %36 = arith.truncf %35 : vector<8x64xf32> to vector<8x64xbf16>
    %cst_18 = arith.constant dense<0.000000e+00> : vector<8x256xf32>
    %37 = tpu.matmul %36, %3, %cst_18 {dimension_numbers = #tpu.dot_dimension_numbers<[1], [0], [0], [1], [0, 0, 1, 1], [], []>} : vector<8x64xbf16>, vector<64x256xbf16>, vector<8x256xf32> -> vector<8x256xf32>
    %cst_19 = arith.constant dense<0.000000e+00> : vector<8x256xf32>
    %38 = tpu.matmul %10, %4, %cst_19 {dimension_numbers = #tpu.dot_dimension_numbers<[1], [0], [0], [1], [0, 0, 1, 1], [], []>} : vector<8x64xbf16>, vector<64x256xbf16>, vector<8x256xf32> -> vector<8x256xf32>
    %39 = arith.addf %37, %38 : vector<8x256xf32>
    %40 = arith.addf %39, %7 : vector<8x256xf32>
    %41 = vector.extract_strided_slice %40 {offsets = [0, 0], sizes = [8, 192], strides = [1, 1]} : vector<8x256xf32> to vector<8x192xf32>
    %42 = arith.negf %41 : vector<8x192xf32>
    %43 = math.exp %42 : vector<8x192xf32>
    %cst_20 = arith.constant 1.000000e+00 : f32
    %44 = vector.broadcast %cst_20 : f32 to vector<8x192xf32>
    %45 = arith.addf %44, %43 : vector<8x192xf32>
    %46 = arith.divf %44, %45 : vector<8x192xf32>
    %47 = vector.extract_strided_slice %40 {offsets = [0, 192], sizes = [8, 64], strides = [1, 1]} : vector<8x256xf32> to vector<8x64xf32>
    %48 = math.tanh %47 : vector<8x64xf32>
    %49 = vector.extract_strided_slice %46 {offsets = [0, 0], sizes = [8, 64], strides = [1, 1]} : vector<8x192xf32> to vector<8x64xf32>
    %50 = vector.extract_strided_slice %46 {offsets = [0, 64], sizes = [8, 64], strides = [1, 1]} : vector<8x192xf32> to vector<8x64xf32>
    %51 = vector.extract_strided_slice %46 {offsets = [0, 128], sizes = [8, 64], strides = [1, 1]} : vector<8x192xf32> to vector<8x64xf32>
    %52 = arith.mulf %50, %8 : vector<8x64xf32>
    %53 = arith.mulf %49, %48 : vector<8x64xf32>
    %54 = arith.addf %52, %53 : vector<8x64xf32>
    %55 = math.tanh %54 : vector<8x64xf32>
    %56 = arith.mulf %51, %55 : vector<8x64xf32>
    %57 = arith.truncf %56 : vector<8x64xf32> to vector<8x64xbf16>
    %c1 = arith.constant 1 : index
    %c0_21 = arith.constant 0 : index
    %c0_22 = arith.constant 0 : index
    %58 = vector.load %arg1[%c1, %c0_21, %c0_22] : memref<8x8x1xf32, #tpu.memory_space<vmem>>, vector<1x8x1xf32>
    %59 = vector.shape_cast %58 : vector<1x8x1xf32> to vector<8x1xf32>
    %60 = vector.broadcast %59 : vector<8x1xf32> to vector<8x256xf32>
    %61 = vector.broadcast %0 : vector<1x256xf32> to vector<8x256xf32>
    %62 = arith.mulf %60, %61 : vector<8x256xf32>
    %63 = vector.broadcast %1 : vector<1x256xf32> to vector<8x256xf32>
    %64 = arith.addf %62, %63 : vector<8x256xf32>
    %cst_23 = arith.constant dense<0.000000e+00> : vector<8x256xf32>
    %65 = tpu.matmul %36, %2, %cst_23 {dimension_numbers = #tpu.dot_dimension_numbers<[1], [0], [0], [1], [0, 0, 1, 1], [], []>} : vector<8x64xbf16>, vector<64x256xbf16>, vector<8x256xf32> -> vector<8x256xf32>
    %66 = arith.addf %64, %65 : vector<8x256xf32>
    %67 = vector.extract_strided_slice %66 {offsets = [0, 0], sizes = [8, 192], strides = [1, 1]} : vector<8x256xf32> to vector<8x192xf32>
    %68 = arith.negf %67 : vector<8x192xf32>
    %69 = math.exp %68 : vector<8x192xf32>
    %cst_24 = arith.constant 1.000000e+00 : f32
    %70 = vector.broadcast %cst_24 : f32 to vector<8x192xf32>
    %71 = arith.addf %70, %69 : vector<8x192xf32>
    %72 = arith.divf %70, %71 : vector<8x192xf32>
    %73 = vector.extract_strided_slice %66 {offsets = [0, 192], sizes = [8, 64], strides = [1, 1]} : vector<8x256xf32> to vector<8x64xf32>
    %74 = math.tanh %73 : vector<8x64xf32>
    %75 = vector.extract_strided_slice %72 {offsets = [0, 0], sizes = [8, 64], strides = [1, 1]} : vector<8x192xf32> to vector<8x64xf32>
    %76 = vector.extract_strided_slice %72 {offsets = [0, 64], sizes = [8, 64], strides = [1, 1]} : vector<8x192xf32> to vector<8x64xf32>
    %77 = vector.extract_strided_slice %72 {offsets = [0, 128], sizes = [8, 64], strides = [1, 1]} : vector<8x192xf32> to vector<8x64xf32>
    %78 = arith.mulf %76, %33 : vector<8x64xf32>
    %79 = arith.mulf %75, %74 : vector<8x64xf32>
    %80 = arith.addf %78, %79 : vector<8x64xf32>
    %81 = math.tanh %80 : vector<8x64xf32>
    %82 = arith.mulf %77, %81 : vector<8x64xf32>
    %83 = arith.truncf %82 : vector<8x64xf32> to vector<8x64xbf16>
    %cst_25 = arith.constant dense<0.000000e+00> : vector<8x256xf32>
    %84 = tpu.matmul %83, %3, %cst_25 {dimension_numbers = #tpu.dot_dimension_numbers<[1], [0], [0], [1], [0, 0, 1, 1], [], []>} : vector<8x64xbf16>, vector<64x256xbf16>, vector<8x256xf32> -> vector<8x256xf32>
    %cst_26 = arith.constant dense<0.000000e+00> : vector<8x256xf32>
    %85 = tpu.matmul %57, %4, %cst_26 {dimension_numbers = #tpu.dot_dimension_numbers<[1], [0], [0], [1], [0, 0, 1, 1], [], []>} : vector<8x64xbf16>, vector<64x256xbf16>, vector<8x256xf32> -> vector<8x256xf32>
    %86 = arith.addf %84, %85 : vector<8x256xf32>
    %87 = arith.addf %86, %7 : vector<8x256xf32>
    %88 = vector.extract_strided_slice %87 {offsets = [0, 0], sizes = [8, 192], strides = [1, 1]} : vector<8x256xf32> to vector<8x192xf32>
    %89 = arith.negf %88 : vector<8x192xf32>
    %90 = math.exp %89 : vector<8x192xf32>
    %cst_27 = arith.constant 1.000000e+00 : f32
    %91 = vector.broadcast %cst_27 : f32 to vector<8x192xf32>
    %92 = arith.addf %91, %90 : vector<8x192xf32>
    %93 = arith.divf %91, %92 : vector<8x192xf32>
    %94 = vector.extract_strided_slice %87 {offsets = [0, 192], sizes = [8, 64], strides = [1, 1]} : vector<8x256xf32> to vector<8x64xf32>
    %95 = math.tanh %94 : vector<8x64xf32>
    %96 = vector.extract_strided_slice %93 {offsets = [0, 0], sizes = [8, 64], strides = [1, 1]} : vector<8x192xf32> to vector<8x64xf32>
    %97 = vector.extract_strided_slice %93 {offsets = [0, 64], sizes = [8, 64], strides = [1, 1]} : vector<8x192xf32> to vector<8x64xf32>
    %98 = vector.extract_strided_slice %93 {offsets = [0, 128], sizes = [8, 64], strides = [1, 1]} : vector<8x192xf32> to vector<8x64xf32>
    %99 = arith.mulf %97, %54 : vector<8x64xf32>
    %100 = arith.mulf %96, %95 : vector<8x64xf32>
    %101 = arith.addf %99, %100 : vector<8x64xf32>
    %102 = math.tanh %101 : vector<8x64xf32>
    %103 = arith.mulf %98, %102 : vector<8x64xf32>
    %104 = arith.truncf %103 : vector<8x64xf32> to vector<8x64xbf16>
    %c2 = arith.constant 2 : index
    %c0_28 = arith.constant 0 : index
    %c0_29 = arith.constant 0 : index
    %105 = vector.load %arg1[%c2, %c0_28, %c0_29] : memref<8x8x1xf32, #tpu.memory_space<vmem>>, vector<1x8x1xf32>
    %106 = vector.shape_cast %105 : vector<1x8x1xf32> to vector<8x1xf32>
    %107 = vector.broadcast %106 : vector<8x1xf32> to vector<8x256xf32>
    %108 = vector.broadcast %0 : vector<1x256xf32> to vector<8x256xf32>
    %109 = arith.mulf %107, %108 : vector<8x256xf32>
    %110 = vector.broadcast %1 : vector<1x256xf32> to vector<8x256xf32>
    %111 = arith.addf %109, %110 : vector<8x256xf32>
    %cst_30 = arith.constant dense<0.000000e+00> : vector<8x256xf32>
    %112 = tpu.matmul %83, %2, %cst_30 {dimension_numbers = #tpu.dot_dimension_numbers<[1], [0], [0], [1], [0, 0, 1, 1], [], []>} : vector<8x64xbf16>, vector<64x256xbf16>, vector<8x256xf32> -> vector<8x256xf32>
    %113 = arith.addf %111, %112 : vector<8x256xf32>
    %114 = vector.extract_strided_slice %113 {offsets = [0, 0], sizes = [8, 192], strides = [1, 1]} : vector<8x256xf32> to vector<8x192xf32>
    %115 = arith.negf %114 : vector<8x192xf32>
    %116 = math.exp %115 : vector<8x192xf32>
    %cst_31 = arith.constant 1.000000e+00 : f32
    %117 = vector.broadcast %cst_31 : f32 to vector<8x192xf32>
    %118 = arith.addf %117, %116 : vector<8x192xf32>
    %119 = arith.divf %117, %118 : vector<8x192xf32>
    %120 = vector.extract_strided_slice %113 {offsets = [0, 192], sizes = [8, 64], strides = [1, 1]} : vector<8x256xf32> to vector<8x64xf32>
    %121 = math.tanh %120 : vector<8x64xf32>
    %122 = vector.extract_strided_slice %119 {offsets = [0, 0], sizes = [8, 64], strides = [1, 1]} : vector<8x192xf32> to vector<8x64xf32>
    %123 = vector.extract_strided_slice %119 {offsets = [0, 64], sizes = [8, 64], strides = [1, 1]} : vector<8x192xf32> to vector<8x64xf32>
    %124 = vector.extract_strided_slice %119 {offsets = [0, 128], sizes = [8, 64], strides = [1, 1]} : vector<8x192xf32> to vector<8x64xf32>
    %125 = arith.mulf %123, %80 : vector<8x64xf32>
    %126 = arith.mulf %122, %121 : vector<8x64xf32>
    %127 = arith.addf %125, %126 : vector<8x64xf32>
    %128 = math.tanh %127 : vector<8x64xf32>
    %129 = arith.mulf %124, %128 : vector<8x64xf32>
    %130 = arith.truncf %129 : vector<8x64xf32> to vector<8x64xbf16>
    %cst_32 = arith.constant dense<0.000000e+00> : vector<8x256xf32>
    %131 = tpu.matmul %130, %3, %cst_32 {dimension_numbers = #tpu.dot_dimension_numbers<[1], [0], [0], [1], [0, 0, 1, 1], [], []>} : vector<8x64xbf16>, vector<64x256xbf16>, vector<8x256xf32> -> vector<8x256xf32>
    %cst_33 = arith.constant dense<0.000000e+00> : vector<8x256xf32>
    %132 = tpu.matmul %104, %4, %cst_33 {dimension_numbers = #tpu.dot_dimension_numbers<[1], [0], [0], [1], [0, 0, 1, 1], [], []>} : vector<8x64xbf16>, vector<64x256xbf16>, vector<8x256xf32> -> vector<8x256xf32>
    %133 = arith.addf %131, %132 : vector<8x256xf32>
    %134 = arith.addf %133, %7 : vector<8x256xf32>
    %135 = vector.extract_strided_slice %134 {offsets = [0, 0], sizes = [8, 192], strides = [1, 1]} : vector<8x256xf32> to vector<8x192xf32>
    %136 = arith.negf %135 : vector<8x192xf32>
    %137 = math.exp %136 : vector<8x192xf32>
    %cst_34 = arith.constant 1.000000e+00 : f32
    %138 = vector.broadcast %cst_34 : f32 to vector<8x192xf32>
    %139 = arith.addf %138, %137 : vector<8x192xf32>
    %140 = arith.divf %138, %139 : vector<8x192xf32>
    %141 = vector.extract_strided_slice %134 {offsets = [0, 192], sizes = [8, 64], strides = [1, 1]} : vector<8x256xf32> to vector<8x64xf32>
    %142 = math.tanh %141 : vector<8x64xf32>
    %143 = vector.extract_strided_slice %140 {offsets = [0, 0], sizes = [8, 64], strides = [1, 1]} : vector<8x192xf32> to vector<8x64xf32>
    %144 = vector.extract_strided_slice %140 {offsets = [0, 64], sizes = [8, 64], strides = [1, 1]} : vector<8x192xf32> to vector<8x64xf32>
    %145 = vector.extract_strided_slice %140 {offsets = [0, 128], sizes = [8, 64], strides = [1, 1]} : vector<8x192xf32> to vector<8x64xf32>
    %146 = arith.mulf %144, %101 : vector<8x64xf32>
    %147 = arith.mulf %143, %142 : vector<8x64xf32>
    %148 = arith.addf %146, %147 : vector<8x64xf32>
    %149 = math.tanh %148 : vector<8x64xf32>
    %150 = arith.mulf %145, %149 : vector<8x64xf32>
    %151 = arith.truncf %150 : vector<8x64xf32> to vector<8x64xbf16>
    %c3 = arith.constant 3 : index
    %c0_35 = arith.constant 0 : index
    %c0_36 = arith.constant 0 : index
    %152 = vector.load %arg1[%c3, %c0_35, %c0_36] : memref<8x8x1xf32, #tpu.memory_space<vmem>>, vector<1x8x1xf32>
    %153 = vector.shape_cast %152 : vector<1x8x1xf32> to vector<8x1xf32>
    %154 = vector.broadcast %153 : vector<8x1xf32> to vector<8x256xf32>
    %155 = vector.broadcast %0 : vector<1x256xf32> to vector<8x256xf32>
    %156 = arith.mulf %154, %155 : vector<8x256xf32>
    %157 = vector.broadcast %1 : vector<1x256xf32> to vector<8x256xf32>
    %158 = arith.addf %156, %157 : vector<8x256xf32>
    %cst_37 = arith.constant dense<0.000000e+00> : vector<8x256xf32>
    %159 = tpu.matmul %130, %2, %cst_37 {dimension_numbers = #tpu.dot_dimension_numbers<[1], [0], [0], [1], [0, 0, 1, 1], [], []>} : vector<8x64xbf16>, vector<64x256xbf16>, vector<8x256xf32> -> vector<8x256xf32>
    %160 = arith.addf %158, %159 : vector<8x256xf32>
    %161 = vector.extract_strided_slice %160 {offsets = [0, 0], sizes = [8, 192], strides = [1, 1]} : vector<8x256xf32> to vector<8x192xf32>
    %162 = arith.negf %161 : vector<8x192xf32>
    %163 = math.exp %162 : vector<8x192xf32>
    %cst_38 = arith.constant 1.000000e+00 : f32
    %164 = vector.broadcast %cst_38 : f32 to vector<8x192xf32>
    %165 = arith.addf %164, %163 : vector<8x192xf32>
    %166 = arith.divf %164, %165 : vector<8x192xf32>
    %167 = vector.extract_strided_slice %160 {offsets = [0, 192], sizes = [8, 64], strides = [1, 1]} : vector<8x256xf32> to vector<8x64xf32>
    %168 = math.tanh %167 : vector<8x64xf32>
    %169 = vector.extract_strided_slice %166 {offsets = [0, 0], sizes = [8, 64], strides = [1, 1]} : vector<8x192xf32> to vector<8x64xf32>
    %170 = vector.extract_strided_slice %166 {offsets = [0, 64], sizes = [8, 64], strides = [1, 1]} : vector<8x192xf32> to vector<8x64xf32>
    %171 = vector.extract_strided_slice %166 {offsets = [0, 128], sizes = [8, 64], strides = [1, 1]} : vector<8x192xf32> to vector<8x64xf32>
    %172 = arith.mulf %170, %127 : vector<8x64xf32>
    %173 = arith.mulf %169, %168 : vector<8x64xf32>
    %174 = arith.addf %172, %173 : vector<8x64xf32>
    %175 = math.tanh %174 : vector<8x64xf32>
    %176 = arith.mulf %171, %175 : vector<8x64xf32>
    %177 = arith.truncf %176 : vector<8x64xf32> to vector<8x64xbf16>
    %cst_39 = arith.constant dense<0.000000e+00> : vector<8x256xf32>
    %178 = tpu.matmul %177, %3, %cst_39 {dimension_numbers = #tpu.dot_dimension_numbers<[1], [0], [0], [1], [0, 0, 1, 1], [], []>} : vector<8x64xbf16>, vector<64x256xbf16>, vector<8x256xf32> -> vector<8x256xf32>
    %cst_40 = arith.constant dense<0.000000e+00> : vector<8x256xf32>
    %179 = tpu.matmul %151, %4, %cst_40 {dimension_numbers = #tpu.dot_dimension_numbers<[1], [0], [0], [1], [0, 0, 1, 1], [], []>} : vector<8x64xbf16>, vector<64x256xbf16>, vector<8x256xf32> -> vector<8x256xf32>
    %180 = arith.addf %178, %179 : vector<8x256xf32>
    %181 = arith.addf %180, %7 : vector<8x256xf32>
    %182 = vector.extract_strided_slice %181 {offsets = [0, 0], sizes = [8, 192], strides = [1, 1]} : vector<8x256xf32> to vector<8x192xf32>
    %183 = arith.negf %182 : vector<8x192xf32>
    %184 = math.exp %183 : vector<8x192xf32>
    %cst_41 = arith.constant 1.000000e+00 : f32
    %185 = vector.broadcast %cst_41 : f32 to vector<8x192xf32>
    %186 = arith.addf %185, %184 : vector<8x192xf32>
    %187 = arith.divf %185, %186 : vector<8x192xf32>
    %188 = vector.extract_strided_slice %181 {offsets = [0, 192], sizes = [8, 64], strides = [1, 1]} : vector<8x256xf32> to vector<8x64xf32>
    %189 = math.tanh %188 : vector<8x64xf32>
    %190 = vector.extract_strided_slice %187 {offsets = [0, 0], sizes = [8, 64], strides = [1, 1]} : vector<8x192xf32> to vector<8x64xf32>
    %191 = vector.extract_strided_slice %187 {offsets = [0, 64], sizes = [8, 64], strides = [1, 1]} : vector<8x192xf32> to vector<8x64xf32>
    %192 = vector.extract_strided_slice %187 {offsets = [0, 128], sizes = [8, 64], strides = [1, 1]} : vector<8x192xf32> to vector<8x64xf32>
    %193 = arith.mulf %191, %148 : vector<8x64xf32>
    %194 = arith.mulf %190, %189 : vector<8x64xf32>
    %195 = arith.addf %193, %194 : vector<8x64xf32>
    %196 = math.tanh %195 : vector<8x64xf32>
    %197 = arith.mulf %192, %196 : vector<8x64xf32>
    %198 = arith.truncf %197 : vector<8x64xf32> to vector<8x64xbf16>
    %c4 = arith.constant 4 : index
    %c0_42 = arith.constant 0 : index
    %c0_43 = arith.constant 0 : index
    %199 = vector.load %arg1[%c4, %c0_42, %c0_43] : memref<8x8x1xf32, #tpu.memory_space<vmem>>, vector<1x8x1xf32>
    %200 = vector.shape_cast %199 : vector<1x8x1xf32> to vector<8x1xf32>
    %201 = vector.broadcast %200 : vector<8x1xf32> to vector<8x256xf32>
    %202 = vector.broadcast %0 : vector<1x256xf32> to vector<8x256xf32>
    %203 = arith.mulf %201, %202 : vector<8x256xf32>
    %204 = vector.broadcast %1 : vector<1x256xf32> to vector<8x256xf32>
    %205 = arith.addf %203, %204 : vector<8x256xf32>
    %cst_44 = arith.constant dense<0.000000e+00> : vector<8x256xf32>
    %206 = tpu.matmul %177, %2, %cst_44 {dimension_numbers = #tpu.dot_dimension_numbers<[1], [0], [0], [1], [0, 0, 1, 1], [], []>} : vector<8x64xbf16>, vector<64x256xbf16>, vector<8x256xf32> -> vector<8x256xf32>
    %207 = arith.addf %205, %206 : vector<8x256xf32>
    %208 = vector.extract_strided_slice %207 {offsets = [0, 0], sizes = [8, 192], strides = [1, 1]} : vector<8x256xf32> to vector<8x192xf32>
    %209 = arith.negf %208 : vector<8x192xf32>
    %210 = math.exp %209 : vector<8x192xf32>
    %cst_45 = arith.constant 1.000000e+00 : f32
    %211 = vector.broadcast %cst_45 : f32 to vector<8x192xf32>
    %212 = arith.addf %211, %210 : vector<8x192xf32>
    %213 = arith.divf %211, %212 : vector<8x192xf32>
    %214 = vector.extract_strided_slice %207 {offsets = [0, 192], sizes = [8, 64], strides = [1, 1]} : vector<8x256xf32> to vector<8x64xf32>
    %215 = math.tanh %214 : vector<8x64xf32>
    %216 = vector.extract_strided_slice %213 {offsets = [0, 0], sizes = [8, 64], strides = [1, 1]} : vector<8x192xf32> to vector<8x64xf32>
    %217 = vector.extract_strided_slice %213 {offsets = [0, 64], sizes = [8, 64], strides = [1, 1]} : vector<8x192xf32> to vector<8x64xf32>
    %218 = vector.extract_strided_slice %213 {offsets = [0, 128], sizes = [8, 64], strides = [1, 1]} : vector<8x192xf32> to vector<8x64xf32>
    %219 = arith.mulf %217, %174 : vector<8x64xf32>
    %220 = arith.mulf %216, %215 : vector<8x64xf32>
    %221 = arith.addf %219, %220 : vector<8x64xf32>
    %222 = math.tanh %221 : vector<8x64xf32>
    %223 = arith.mulf %218, %222 : vector<8x64xf32>
    %224 = arith.truncf %223 : vector<8x64xf32> to vector<8x64xbf16>
    %cst_46 = arith.constant dense<0.000000e+00> : vector<8x256xf32>
    %225 = tpu.matmul %224, %3, %cst_46 {dimension_numbers = #tpu.dot_dimension_numbers<[1], [0], [0], [1], [0, 0, 1, 1], [], []>} : vector<8x64xbf16>, vector<64x256xbf16>, vector<8x256xf32> -> vector<8x256xf32>
    %cst_47 = arith.constant dense<0.000000e+00> : vector<8x256xf32>
    %226 = tpu.matmul %198, %4, %cst_47 {dimension_numbers = #tpu.dot_dimension_numbers<[1], [0], [0], [1], [0, 0, 1, 1], [], []>} : vector<8x64xbf16>, vector<64x256xbf16>, vector<8x256xf32> -> vector<8x256xf32>
    %227 = arith.addf %225, %226 : vector<8x256xf32>
    %228 = arith.addf %227, %7 : vector<8x256xf32>
    %229 = vector.extract_strided_slice %228 {offsets = [0, 0], sizes = [8, 192], strides = [1, 1]} : vector<8x256xf32> to vector<8x192xf32>
    %230 = arith.negf %229 : vector<8x192xf32>
    %231 = math.exp %230 : vector<8x192xf32>
    %cst_48 = arith.constant 1.000000e+00 : f32
    %232 = vector.broadcast %cst_48 : f32 to vector<8x192xf32>
    %233 = arith.addf %232, %231 : vector<8x192xf32>
    %234 = arith.divf %232, %233 : vector<8x192xf32>
    %235 = vector.extract_strided_slice %228 {offsets = [0, 192], sizes = [8, 64], strides = [1, 1]} : vector<8x256xf32> to vector<8x64xf32>
    %236 = math.tanh %235 : vector<8x64xf32>
    %237 = vector.extract_strided_slice %234 {offsets = [0, 0], sizes = [8, 64], strides = [1, 1]} : vector<8x192xf32> to vector<8x64xf32>
    %238 = vector.extract_strided_slice %234 {offsets = [0, 64], sizes = [8, 64], strides = [1, 1]} : vector<8x192xf32> to vector<8x64xf32>
    %239 = vector.extract_strided_slice %234 {offsets = [0, 128], sizes = [8, 64], strides = [1, 1]} : vector<8x192xf32> to vector<8x64xf32>
    %240 = arith.mulf %238, %195 : vector<8x64xf32>
    %241 = arith.mulf %237, %236 : vector<8x64xf32>
    %242 = arith.addf %240, %241 : vector<8x64xf32>
    %243 = math.tanh %242 : vector<8x64xf32>
    %244 = arith.mulf %239, %243 : vector<8x64xf32>
    %245 = arith.truncf %244 : vector<8x64xf32> to vector<8x64xbf16>
    %c5 = arith.constant 5 : index
    %c0_49 = arith.constant 0 : index
    %c0_50 = arith.constant 0 : index
    %246 = vector.load %arg1[%c5, %c0_49, %c0_50] : memref<8x8x1xf32, #tpu.memory_space<vmem>>, vector<1x8x1xf32>
    %247 = vector.shape_cast %246 : vector<1x8x1xf32> to vector<8x1xf32>
    %248 = vector.broadcast %247 : vector<8x1xf32> to vector<8x256xf32>
    %249 = vector.broadcast %0 : vector<1x256xf32> to vector<8x256xf32>
    %250 = arith.mulf %248, %249 : vector<8x256xf32>
    %251 = vector.broadcast %1 : vector<1x256xf32> to vector<8x256xf32>
    %252 = arith.addf %250, %251 : vector<8x256xf32>
    %cst_51 = arith.constant dense<0.000000e+00> : vector<8x256xf32>
    %253 = tpu.matmul %224, %2, %cst_51 {dimension_numbers = #tpu.dot_dimension_numbers<[1], [0], [0], [1], [0, 0, 1, 1], [], []>} : vector<8x64xbf16>, vector<64x256xbf16>, vector<8x256xf32> -> vector<8x256xf32>
    %254 = arith.addf %252, %253 : vector<8x256xf32>
    %255 = vector.extract_strided_slice %254 {offsets = [0, 0], sizes = [8, 192], strides = [1, 1]} : vector<8x256xf32> to vector<8x192xf32>
    %256 = arith.negf %255 : vector<8x192xf32>
    %257 = math.exp %256 : vector<8x192xf32>
    %cst_52 = arith.constant 1.000000e+00 : f32
    %258 = vector.broadcast %cst_52 : f32 to vector<8x192xf32>
    %259 = arith.addf %258, %257 : vector<8x192xf32>
    %260 = arith.divf %258, %259 : vector<8x192xf32>
    %261 = vector.extract_strided_slice %254 {offsets = [0, 192], sizes = [8, 64], strides = [1, 1]} : vector<8x256xf32> to vector<8x64xf32>
    %262 = math.tanh %261 : vector<8x64xf32>
    %263 = vector.extract_strided_slice %260 {offsets = [0, 0], sizes = [8, 64], strides = [1, 1]} : vector<8x192xf32> to vector<8x64xf32>
    %264 = vector.extract_strided_slice %260 {offsets = [0, 64], sizes = [8, 64], strides = [1, 1]} : vector<8x192xf32> to vector<8x64xf32>
    %265 = vector.extract_strided_slice %260 {offsets = [0, 128], sizes = [8, 64], strides = [1, 1]} : vector<8x192xf32> to vector<8x64xf32>
    %266 = arith.mulf %264, %221 : vector<8x64xf32>
    %267 = arith.mulf %263, %262 : vector<8x64xf32>
    %268 = arith.addf %266, %267 : vector<8x64xf32>
    %269 = math.tanh %268 : vector<8x64xf32>
    %270 = arith.mulf %265, %269 : vector<8x64xf32>
    %271 = arith.truncf %270 : vector<8x64xf32> to vector<8x64xbf16>
    %cst_53 = arith.constant dense<0.000000e+00> : vector<8x256xf32>
    %272 = tpu.matmul %271, %3, %cst_53 {dimension_numbers = #tpu.dot_dimension_numbers<[1], [0], [0], [1], [0, 0, 1, 1], [], []>} : vector<8x64xbf16>, vector<64x256xbf16>, vector<8x256xf32> -> vector<8x256xf32>
    %cst_54 = arith.constant dense<0.000000e+00> : vector<8x256xf32>
    %273 = tpu.matmul %245, %4, %cst_54 {dimension_numbers = #tpu.dot_dimension_numbers<[1], [0], [0], [1], [0, 0, 1, 1], [], []>} : vector<8x64xbf16>, vector<64x256xbf16>, vector<8x256xf32> -> vector<8x256xf32>
    %274 = arith.addf %272, %273 : vector<8x256xf32>
    %275 = arith.addf %274, %7 : vector<8x256xf32>
    %276 = vector.extract_strided_slice %275 {offsets = [0, 0], sizes = [8, 192], strides = [1, 1]} : vector<8x256xf32> to vector<8x192xf32>
    %277 = arith.negf %276 : vector<8x192xf32>
    %278 = math.exp %277 : vector<8x192xf32>
    %cst_55 = arith.constant 1.000000e+00 : f32
    %279 = vector.broadcast %cst_55 : f32 to vector<8x192xf32>
    %280 = arith.addf %279, %278 : vector<8x192xf32>
    %281 = arith.divf %279, %280 : vector<8x192xf32>
    %282 = vector.extract_strided_slice %275 {offsets = [0, 192], sizes = [8, 64], strides = [1, 1]} : vector<8x256xf32> to vector<8x64xf32>
    %283 = math.tanh %282 : vector<8x64xf32>
    %284 = vector.extract_strided_slice %281 {offsets = [0, 0], sizes = [8, 64], strides = [1, 1]} : vector<8x192xf32> to vector<8x64xf32>
    %285 = vector.extract_strided_slice %281 {offsets = [0, 64], sizes = [8, 64], strides = [1, 1]} : vector<8x192xf32> to vector<8x64xf32>
    %286 = vector.extract_strided_slice %281 {offsets = [0, 128], sizes = [8, 64], strides = [1, 1]} : vector<8x192xf32> to vector<8x64xf32>
    %287 = arith.mulf %285, %242 : vector<8x64xf32>
    %288 = arith.mulf %284, %283 : vector<8x64xf32>
    %289 = arith.addf %287, %288 : vector<8x64xf32>
    %290 = math.tanh %289 : vector<8x64xf32>
    %291 = arith.mulf %286, %290 : vector<8x64xf32>
    %292 = arith.truncf %291 : vector<8x64xf32> to vector<8x64xbf16>
    %c6 = arith.constant 6 : index
    %c0_56 = arith.constant 0 : index
    %c0_57 = arith.constant 0 : index
    %293 = vector.load %arg1[%c6, %c0_56, %c0_57] : memref<8x8x1xf32, #tpu.memory_space<vmem>>, vector<1x8x1xf32>
    %294 = vector.shape_cast %293 : vector<1x8x1xf32> to vector<8x1xf32>
    %295 = vector.broadcast %294 : vector<8x1xf32> to vector<8x256xf32>
    %296 = vector.broadcast %0 : vector<1x256xf32> to vector<8x256xf32>
    %297 = arith.mulf %295, %296 : vector<8x256xf32>
    %298 = vector.broadcast %1 : vector<1x256xf32> to vector<8x256xf32>
    %299 = arith.addf %297, %298 : vector<8x256xf32>
    %cst_58 = arith.constant dense<0.000000e+00> : vector<8x256xf32>
    %300 = tpu.matmul %271, %2, %cst_58 {dimension_numbers = #tpu.dot_dimension_numbers<[1], [0], [0], [1], [0, 0, 1, 1], [], []>} : vector<8x64xbf16>, vector<64x256xbf16>, vector<8x256xf32> -> vector<8x256xf32>
    %301 = arith.addf %299, %300 : vector<8x256xf32>
    %302 = vector.extract_strided_slice %301 {offsets = [0, 0], sizes = [8, 192], strides = [1, 1]} : vector<8x256xf32> to vector<8x192xf32>
    %303 = arith.negf %302 : vector<8x192xf32>
    %304 = math.exp %303 : vector<8x192xf32>
    %cst_59 = arith.constant 1.000000e+00 : f32
    %305 = vector.broadcast %cst_59 : f32 to vector<8x192xf32>
    %306 = arith.addf %305, %304 : vector<8x192xf32>
    %307 = arith.divf %305, %306 : vector<8x192xf32>
    %308 = vector.extract_strided_slice %301 {offsets = [0, 192], sizes = [8, 64], strides = [1, 1]} : vector<8x256xf32> to vector<8x64xf32>
    %309 = math.tanh %308 : vector<8x64xf32>
    %310 = vector.extract_strided_slice %307 {offsets = [0, 0], sizes = [8, 64], strides = [1, 1]} : vector<8x192xf32> to vector<8x64xf32>
    %311 = vector.extract_strided_slice %307 {offsets = [0, 64], sizes = [8, 64], strides = [1, 1]} : vector<8x192xf32> to vector<8x64xf32>
    %312 = vector.extract_strided_slice %307 {offsets = [0, 128], sizes = [8, 64], strides = [1, 1]} : vector<8x192xf32> to vector<8x64xf32>
    %313 = arith.mulf %311, %268 : vector<8x64xf32>
    %314 = arith.mulf %310, %309 : vector<8x64xf32>
    %315 = arith.addf %313, %314 : vector<8x64xf32>
    %316 = math.tanh %315 : vector<8x64xf32>
    %317 = arith.mulf %312, %316 : vector<8x64xf32>
    %318 = arith.truncf %317 : vector<8x64xf32> to vector<8x64xbf16>
    %cst_60 = arith.constant dense<0.000000e+00> : vector<8x256xf32>
    %319 = tpu.matmul %318, %3, %cst_60 {dimension_numbers = #tpu.dot_dimension_numbers<[1], [0], [0], [1], [0, 0, 1, 1], [], []>} : vector<8x64xbf16>, vector<64x256xbf16>, vector<8x256xf32> -> vector<8x256xf32>
    %cst_61 = arith.constant dense<0.000000e+00> : vector<8x256xf32>
    %320 = tpu.matmul %292, %4, %cst_61 {dimension_numbers = #tpu.dot_dimension_numbers<[1], [0], [0], [1], [0, 0, 1, 1], [], []>} : vector<8x64xbf16>, vector<64x256xbf16>, vector<8x256xf32> -> vector<8x256xf32>
    %321 = arith.addf %319, %320 : vector<8x256xf32>
    %322 = arith.addf %321, %7 : vector<8x256xf32>
    %323 = vector.extract_strided_slice %322 {offsets = [0, 0], sizes = [8, 192], strides = [1, 1]} : vector<8x256xf32> to vector<8x192xf32>
    %324 = arith.negf %323 : vector<8x192xf32>
    %325 = math.exp %324 : vector<8x192xf32>
    %cst_62 = arith.constant 1.000000e+00 : f32
    %326 = vector.broadcast %cst_62 : f32 to vector<8x192xf32>
    %327 = arith.addf %326, %325 : vector<8x192xf32>
    %328 = arith.divf %326, %327 : vector<8x192xf32>
    %329 = vector.extract_strided_slice %322 {offsets = [0, 192], sizes = [8, 64], strides = [1, 1]} : vector<8x256xf32> to vector<8x64xf32>
    %330 = math.tanh %329 : vector<8x64xf32>
    %331 = vector.extract_strided_slice %328 {offsets = [0, 0], sizes = [8, 64], strides = [1, 1]} : vector<8x192xf32> to vector<8x64xf32>
    %332 = vector.extract_strided_slice %328 {offsets = [0, 64], sizes = [8, 64], strides = [1, 1]} : vector<8x192xf32> to vector<8x64xf32>
    %333 = vector.extract_strided_slice %328 {offsets = [0, 128], sizes = [8, 64], strides = [1, 1]} : vector<8x192xf32> to vector<8x64xf32>
    %334 = arith.mulf %332, %289 : vector<8x64xf32>
    %335 = arith.mulf %331, %330 : vector<8x64xf32>
    %336 = arith.addf %334, %335 : vector<8x64xf32>
    %337 = math.tanh %336 : vector<8x64xf32>
    %338 = arith.mulf %333, %337 : vector<8x64xf32>
    %339 = arith.truncf %338 : vector<8x64xf32> to vector<8x64xbf16>
    %c7 = arith.constant 7 : index
    %c0_63 = arith.constant 0 : index
    %c0_64 = arith.constant 0 : index
    %340 = vector.load %arg1[%c7, %c0_63, %c0_64] : memref<8x8x1xf32, #tpu.memory_space<vmem>>, vector<1x8x1xf32>
    %341 = vector.shape_cast %340 : vector<1x8x1xf32> to vector<8x1xf32>
    %342 = vector.broadcast %341 : vector<8x1xf32> to vector<8x256xf32>
    %343 = vector.broadcast %0 : vector<1x256xf32> to vector<8x256xf32>
    %344 = arith.mulf %342, %343 : vector<8x256xf32>
    %345 = vector.broadcast %1 : vector<1x256xf32> to vector<8x256xf32>
    %346 = arith.addf %344, %345 : vector<8x256xf32>
    %cst_65 = arith.constant dense<0.000000e+00> : vector<8x256xf32>
    %347 = tpu.matmul %318, %2, %cst_65 {dimension_numbers = #tpu.dot_dimension_numbers<[1], [0], [0], [1], [0, 0, 1, 1], [], []>} : vector<8x64xbf16>, vector<64x256xbf16>, vector<8x256xf32> -> vector<8x256xf32>
    %348 = arith.addf %346, %347 : vector<8x256xf32>
    %349 = vector.extract_strided_slice %348 {offsets = [0, 0], sizes = [8, 192], strides = [1, 1]} : vector<8x256xf32> to vector<8x192xf32>
    %350 = arith.negf %349 : vector<8x192xf32>
    %351 = math.exp %350 : vector<8x192xf32>
    %cst_66 = arith.constant 1.000000e+00 : f32
    %352 = vector.broadcast %cst_66 : f32 to vector<8x192xf32>
    %353 = arith.addf %352, %351 : vector<8x192xf32>
    %354 = arith.divf %352, %353 : vector<8x192xf32>
    %355 = vector.extract_strided_slice %348 {offsets = [0, 192], sizes = [8, 64], strides = [1, 1]} : vector<8x256xf32> to vector<8x64xf32>
    %356 = math.tanh %355 : vector<8x64xf32>
    %357 = vector.extract_strided_slice %354 {offsets = [0, 0], sizes = [8, 64], strides = [1, 1]} : vector<8x192xf32> to vector<8x64xf32>
    %358 = vector.extract_strided_slice %354 {offsets = [0, 64], sizes = [8, 64], strides = [1, 1]} : vector<8x192xf32> to vector<8x64xf32>
    %359 = vector.extract_strided_slice %354 {offsets = [0, 128], sizes = [8, 64], strides = [1, 1]} : vector<8x192xf32> to vector<8x64xf32>
    %360 = arith.mulf %358, %315 : vector<8x64xf32>
    %361 = arith.mulf %357, %356 : vector<8x64xf32>
    %362 = arith.addf %360, %361 : vector<8x64xf32>
    %363 = math.tanh %362 : vector<8x64xf32>
    %364 = arith.mulf %359, %363 : vector<8x64xf32>
    %365 = arith.truncf %364 : vector<8x64xf32> to vector<8x64xbf16>
    %cst_67 = arith.constant dense<0.000000e+00> : vector<8x256xf32>
    %366 = tpu.matmul %365, %3, %cst_67 {dimension_numbers = #tpu.dot_dimension_numbers<[1], [0], [0], [1], [0, 0, 1, 1], [], []>} : vector<8x64xbf16>, vector<64x256xbf16>, vector<8x256xf32> -> vector<8x256xf32>
    %cst_68 = arith.constant dense<0.000000e+00> : vector<8x256xf32>
    %367 = tpu.matmul %339, %4, %cst_68 {dimension_numbers = #tpu.dot_dimension_numbers<[1], [0], [0], [1], [0, 0, 1, 1], [], []>} : vector<8x64xbf16>, vector<64x256xbf16>, vector<8x256xf32> -> vector<8x256xf32>
    %368 = arith.addf %366, %367 : vector<8x256xf32>
    %369 = arith.addf %368, %7 : vector<8x256xf32>
    %370 = vector.extract_strided_slice %369 {offsets = [0, 0], sizes = [8, 192], strides = [1, 1]} : vector<8x256xf32> to vector<8x192xf32>
    %371 = arith.negf %370 : vector<8x192xf32>
    %372 = math.exp %371 : vector<8x192xf32>
    %cst_69 = arith.constant 1.000000e+00 : f32
    %373 = vector.broadcast %cst_69 : f32 to vector<8x192xf32>
    %374 = arith.addf %373, %372 : vector<8x192xf32>
    %375 = arith.divf %373, %374 : vector<8x192xf32>
    %376 = vector.extract_strided_slice %369 {offsets = [0, 192], sizes = [8, 64], strides = [1, 1]} : vector<8x256xf32> to vector<8x64xf32>
    %377 = math.tanh %376 : vector<8x64xf32>
    %378 = vector.extract_strided_slice %375 {offsets = [0, 0], sizes = [8, 64], strides = [1, 1]} : vector<8x192xf32> to vector<8x64xf32>
    %379 = vector.extract_strided_slice %375 {offsets = [0, 64], sizes = [8, 64], strides = [1, 1]} : vector<8x192xf32> to vector<8x64xf32>
    %380 = vector.extract_strided_slice %375 {offsets = [0, 128], sizes = [8, 64], strides = [1, 1]} : vector<8x192xf32> to vector<8x64xf32>
    %381 = arith.mulf %379, %336 : vector<8x64xf32>
    %382 = arith.mulf %378, %377 : vector<8x64xf32>
    %383 = arith.addf %381, %382 : vector<8x64xf32>
    %384 = math.tanh %383 : vector<8x64xf32>
    %385 = arith.mulf %380, %384 : vector<8x64xf32>
    %c0_70 = arith.constant 0 : index
    %c0_71 = arith.constant 0 : index
    %386 = vector.load %arg8[%c0_70, %c0_71] : memref<1x64xf32, #tpu.memory_space<vmem>>, vector<1x64xf32>
    %387 = vector.broadcast %386 : vector<1x64xf32> to vector<8x64xf32>
    %388 = arith.mulf %385, %387 : vector<8x64xf32>
    %cst_72 = arith.constant dense<0.000000e+00> : vector<8xf32>
    %389 = vector.multi_reduction <add>, %388, %cst_72 [1] : vector<8x64xf32> to vector<8xf32>
    %390 = vector.shape_cast %389 : vector<8xf32> to vector<8x1xf32>
    %c0_73 = arith.constant 0 : index
    %c0_74 = arith.constant 0 : index
    %391 = vector.load %arg9[%c0_73, %c0_74] : memref<1x1xf32, #tpu.memory_space<vmem>>, vector<1x1xf32>
    %392 = vector.broadcast %391 : vector<1x1xf32> to vector<8x1xf32>
    %393 = arith.addf %390, %392 : vector<8x1xf32>
    %c0_75 = arith.constant 0 : index
    %c0_76 = arith.constant 0 : index
    %394 = vector.load %arg10[%c0_75, %c0_76] : memref<8x1xf32, #tpu.memory_space<vmem>>, vector<8x1xf32>
    tpu.vector_store %arg10[%c0_75, %c0_76], %393 {strides = array<i32>} : memref<8x1xf32, #tpu.memory_space<vmem>>, vector<8x1xf32>,
    return
  }
  func.func @transform_0(%arg0: i32) -> (i32, i32, i32) {
    %c0_i32 = arith.constant 0 : i32
    %c0_i32_0 = arith.constant 0 : i32
    %c0_i32_1 = arith.constant 0 : i32
    return %c0_i32, %arg0, %c0_i32_0 : i32, i32, i32
  }
  func.func @transform_1(%arg0: i32) -> (i32, i32) {
    %c0_i32 = arith.constant 0 : i32
    %c0_i32_0 = arith.constant 0 : i32
    %c0_i32_1 = arith.constant 0 : i32
    return %c0_i32, %c0_i32_0 : i32, i32
  }
  func.func @transform_2(%arg0: i32) -> (i32, i32) {
    %c0_i32 = arith.constant 0 : i32
    %c0_i32_0 = arith.constant 0 : i32
    %c0_i32_1 = arith.constant 0 : i32
    return %c0_i32, %c0_i32_0 : i32, i32
  }
  func.func @transform_3(%arg0: i32) -> (i32, i32) {
    %c0_i32 = arith.constant 0 : i32
    %c0_i32_0 = arith.constant 0 : i32
    %c0_i32_1 = arith.constant 0 : i32
    return %c0_i32, %c0_i32_0 : i32, i32
  }
  func.func @transform_4(%arg0: i32) -> (i32, i32) {
    %c0_i32 = arith.constant 0 : i32
    %c0_i32_0 = arith.constant 0 : i32
    %c0_i32_1 = arith.constant 0 : i32
    return %c0_i32, %c0_i32_0 : i32, i32
  }
  func.func @transform_5(%arg0: i32) -> (i32, i32) {
    %c0_i32 = arith.constant 0 : i32
    %c0_i32_0 = arith.constant 0 : i32
    %c0_i32_1 = arith.constant 0 : i32
    return %c0_i32, %c0_i32_0 : i32, i32
  }
  func.func @transform_6(%arg0: i32) -> (i32, i32) {
    %c0_i32 = arith.constant 0 : i32
    %c0_i32_0 = arith.constant 0 : i32
    %c0_i32_1 = arith.constant 0 : i32
    return %c0_i32, %c0_i32_0 : i32, i32
  }
  func.func @transform_7(%arg0: i32) -> (i32, i32) {
    %c0_i32 = arith.constant 0 : i32
    %c0_i32_0 = arith.constant 0 : i32
    %c0_i32_1 = arith.constant 0 : i32
    return %c0_i32, %c0_i32_0 : i32, i32
  }
  func.func @transform_8(%arg0: i32) -> (i32, i32) {
    %c0_i32 = arith.constant 0 : i32
    %c0_i32_0 = arith.constant 0 : i32
    %c0_i32_1 = arith.constant 0 : i32
    return %c0_i32, %c0_i32_0 : i32, i32
  }
  func.func @transform_9(%arg0: i32) -> (i32, i32) {
    %c0_i32 = arith.constant 0 : i32
    %c0_i32_0 = arith.constant 0 : i32
    return %arg0, %c0_i32 : i32, i32
  }
}

</mosaic_0001>

<bundles_post_ra>
// kernel: tpu_custom_call.1
= control target key start
LH: loop header
LB: loop body
LE: loop exit
PB: predicated region body
PF: predicated region fallthrough
CT: control target
= control target key end

     0   :  { %s3563_s0 = inlined_call_operand.vmem [shape: f32[8,16,1], index: 0, kind: input, shape index: {}]   ;;  %s3564_s1 = inlined_call_operand.vmem [shape: f32[1,256], index: 1, kind: input, shape index: {}]   ;;  %s3565_s2 = inlined_call_operand.vmem [shape: f32[1,256], index: 2, kind: input, shape index: {}]   ;;  %s3566_s3 = inlined_call_operand.vmem [shape: bf16[64,256], index: 3, kind: input, shape index: {}]   ;;  %s3567_s4 = inlined_call_operand.vmem [shape: bf16[64,256], index: 4, kind: input, shape index: {}]   ;;  %s3568_s5 = inlined_call_operand.hbm [shape: bf16[64,256], index: 5, kind: input, shape index: {}]   ;;  %s3569_s6 = inlined_call_operand.vmem [shape: f32[1,256], index: 6, kind: input, shape index: {}]   ;;  %s3570_s7 = inlined_call_operand.vmem [shape: f32[1,64], index: 7, kind: input, shape index: {}]   ;;  %s3571_s8 = inlined_call_operand.<no memory space> [shape: f32[1,1], index: 8, kind: input, shape index: {}]   ;;  %s3572_s9 = inlined_call_operand.vmem [shape: f32[16,1], index: 9, kind: output, shape index: {}]  }
   0x1   :  { %v14_v0 = vstv %s3571_s8 }
   0x2   :  { %15 = vst [vmem:[#allocation2] sm:$0x1] %v14_v0 }
   0x3   :  { %16 = vsyncpa [#allocation5], 0  ;;  %s2837_s11 = smov 0   ;;  %s2839_s12 = smov 0  }
   0x4   :  { %s2841_s13 = smov 0  }
   0x5 LB: > { %s2853_s8 = sadd.s32 4294967295, %s2777_s13   ;;  %s2856_s14 = sadd.s32 1, %s2777_s13   ;;  %s2777_s13 = sphi %s2841_s13, %s3584_s13   ;;  %s2773_s12 = sphi %s2839_s12, %s3583_s12   ;;  %s2769_s11 = sphi %s2837_s11, %s3582_s11  }
   0x6   : > { %s26_s15 = ssub.s32 %s2777_s13, %s2856_s14  ;;  %s29_s16 = sadd.s32 1, %s2773_s12 }
   0x7   : > { %p27_p0 = scmp.eq.s32.totalorder %s26_s15, 0  ;;  %p36_p1 = scmp.ne.s32.totalorder %s2773_s12, %s2769_s11 }
   0x8   : > { %p37_p2 = scmp.eq.s32.totalorder %s2777_s13, 0  ;;  %p2332_p3 = scmp.ge.s32.totalorder %s2777_s13, 1 }
   0x9   : > { %s2866_s17 = scalar_select %p27_p0, %s2773_s12, %s29_s16  }
   0xa   : > { %p2868_p4 = por %p37_p2, %p36_p1  ;;  %p247_p5 = scmp.lt.s32.totalorder %s2777_s13, 3 }
   0xb   : > { %p3573_p6 = scmp.eq.s32.totalorder %s2853_s8, 0  ;;  %s2779_s20 = smov [#allocation4]  }
   0xc   : > { %s3575_s18 = scalar_select %p2868_p4, 1, 0 }
   0xd   : > { %p2874_p7 = pnand %p2332_p3, %p247_p5  ;;  %s271_s21 = sshll.u32 %s2779_s20, 4  ;;  %s272_s21 = int_to_ptr.vmem [resolvable:$true] %s271_s21 }
   0xe   : > { %s2723_s25 = scalar_lea.hbm %s3568_s5, 1024 }
   0xf   : > { %s3576_s19 = scalar_select %p2874_p7, 1, 0 }
  0x10   : > { %p2434_p8 = pneg %p2874_p7  ;;  %p2724_p10 = scmp.ne.s32.totalorder %s3568_s5, %s2723_s25 }
  0x11   : > { %p2730_p0 = scmp.lt.u32.totalorder %s2723_s25, %s3568_s5 }
  0x12   : > { %p2882_p9 = pnand %p3573_p6, %p2434_p8 }
  0x14   : > { %p2725_p11 = pneg %p2882_p9 }
  0x16   : > { %p2726_p12 = pnand %p2725_p11, %p2724_p10 }
  0x18   : > { %p2727_p13 = pneg %p2726_p12 }
  0x1a   : > { %p2732_p1 = pnand %p2730_p0, %p2727_p13 }
  0x1c   : > { %2735 = shalt.err (!%p2732_p1)
}
  0x1d   : > { %s2736_s30 = scalar_lea.vmem %s272_s21, 1024  ;;  %p2744_p8 = scmp.lt.s32.totalorder %s272_s21, %s272_s21 }
  0x1e   : > { %p2737_p2 = scmp.ne.s32.totalorder %s272_s21, %s2736_s30  ;;  %p2745_p6 = scmp.lt.s32.totalorder %s2736_s30, %s2736_s30 }
  0x20   : > { %p2739_p3 = pnand %p2737_p2, %p2725_p11  ;;  %p2746_p7 = por %p2745_p6, %p2744_p8 }
  0x22   : > { %p2740_p5 = pneg %p2739_p3 }
  0x24   : > { %p2747_p4 = pnand %p2746_p7, %p2740_p5 }
  0x26   : > { %2750 = shalt.err (!%p2747_p4)
}
  0x27   : > { %s2780_s10 = smov 128   ;;  %s2781_s15 = smov 8  }
  0x28   : > { %2437 = dma.hbm_to_vmem [thread:$0]  (!%p2882_p9), %s3568_s5, 1024, %s272_s21, [#allocation5], %s2780_s10, %s2780_s10, %s2781_s15  }
  0x29   : > { %p2334_p10 = scmp.ge.s32.totalorder %s2777_s13, 2 }
  0x2a   : > { %p3578_p12 = scmp.ne.s32.totalorder (!%p2334_p10), %s3575_s18, 0 }
  0x2b   : > { %290 = sbr.rel (%p2334_p10) target bundleno = 58 (0x3a), region = 48 }
  0x32   : > { %293 = sbr.rel (!%p3578_p12) target bundleno = 58 (0x3a), region = 52  ;;  %s295_s23 = sand.u32 (%p3578_p12), 1, %s2773_s12  }
  0x33   : > { %s2336_s24 = sshll.u32 (%p3578_p12), %s2777_s13, 3  ;;  %s2335_s25 = sshll.u32 (%p3578_p12), %s295_s23, 6 }
  0x34   : > { %s299_s28 = scalar_lea.vmem (%p3578_p12), %s3563_s0, %s2336_s24  ;;  %s297_s22 = scalar_lea.vmem (%p3578_p12), [#allocation3], %s2335_s25 }
  0x35   : > { %v341_v1 = vld [vmem:[%s299_s28] sm:$0xff] (%p3578_p12)  ;;  %v343_v2 = vld [vmem:[%s299_s28 + $0x10] sm:$0xff] (%p3578_p12) }
  0x36   : > { %v345_v3 = vld [vmem:[%s299_s28 + $0x20] sm:$0xff] (%p3578_p12)  ;;  %342 = vst [vmem:[%s297_s22] sm:$0xff] (%p3578_p12), %v341_v1  ;;  %344 = vst [vmem:[%s297_s22 + $0x8] sm:$0xff] (%p3578_p12), %v343_v2  ;;  %v347_v4 = vld [vmem:[%s299_s28 + $0x30] sm:$0xff] (%p3578_p12) }
  0x37   : > { %346 = vst [vmem:[%s297_s22 + $0x10] sm:$0xff] (%p3578_p12), %v345_v3  ;;  %v349_v5 = vld [vmem:[%s299_s28 + $0x40] sm:$0xff] (%p3578_p12)  ;;  %v351_v6 = vld [vmem:[%s299_s28 + $0x50] sm:$0xff] (%p3578_p12)  ;;  %348 = vst [vmem:[%s297_s22 + $0x18] sm:$0xff] (%p3578_p12), %v347_v4 }
  0x38   : > { %350 = vst [vmem:[%s297_s22 + $0x20] sm:$0xff] (%p3578_p12), %v349_v5  ;;  %352 = vst [vmem:[%s297_s22 + $0x28] sm:$0xff] (%p3578_p12), %v351_v6  ;;  %v353_v7 = vld [vmem:[%s299_s28 + $0x60] sm:$0xff] (%p3578_p12)  ;;  %v355_v8 = vld [vmem:[%s299_s28 + $0x70] sm:$0xff] (%p3578_p12) }
  0x39   : > { %354 = vst [vmem:[%s297_s22 + $0x30] sm:$0xff] %v353_v7  ;;  %356 = vst [vmem:[%s297_s22 + $0x38] sm:$0xff] %v355_v8 }
  0x3a PF: > { %p3579_p4 = scmp.ne.s32.totalorder %s3576_s19, 0 }
  0x3b   : > { %s368_s13 = sand.u32 (!%p3579_p4), 1, %s2769_s11   ;;  %p3580_p6 = scmp.eq.s32.totalorder (!%p3579_p4), %s2853_s8, 0 }
  0x3c   : > { %365 = sbr.rel (%p3579_p4) target bundleno = 5606 (0x15e6), region = 90  ;;  %s2338_s18 = sshll.u32 (!%p3579_p4), %s368_s13, 6 }
  0x3d   : > { %s2913_s21 = scalar_lea.vmem (!%p3579_p4), [#allocation3], %s2338_s18 }
  0x43   : > { %2764 = dma.done.wait (%p3580_p6), [#allocation5], 1024   ;;  %p3581_p7 = pmov %p3580_p6 }
  0x44   : > { %v2782_v9 = vmov 0   ;;  %v2926_v10 = vld [vmem:[%s3566_s3 + $0x4] ss:$8 sps:$4 sm:$0xff]   ;;  %v2931_v11 = vld [vmem:[%s3566_s3] ss:$8 sps:$4 sm:$0xff]   ;;  %v439_v19 = vlaneseq  ;;  %s2783_s30 = smov 64  }
  0x45   : > { %2766 = vsyncadd (%p3581_p7), [#allocation5], 4294966272  ;;  %557 = vmatprep.mubr.bf16.mxu0 %v2782_v9  ;;  %2469 = vset.pattern.permute.xlu0 %v2782_v9  ;;  %v2937_v12 = vld [vmem:[%s3566_s3 + $0x14] ss:$8 sps:$4 sm:$0xff]   ;;  %v2943_v13 = vld [vmem:[%s3566_s3 + $0x10] ss:$8 sps:$4 sm:$0xff]  }
  0x46   : > { %671 = vmatprep.mubr.bf16.mxu1 %v2782_v9  ;;  %2470 = vset.pattern.permute.xlu1 %v2782_v9  ;;  %v2949_v14 = vld [vmem:[%s3566_s3 + $0x24] ss:$8 sps:$4 sm:$0xff]   ;;  %v2954_v15 = vld [vmem:[%s3566_s3 + $0x20] ss:$8 sps:$4 sm:$0xff]   ;;  %v2960_v17 = vld [vmem:[%s3566_s3 + $0x34] ss:$8 sps:$4 sm:$0xff]  }
  0x47   : > { %525 = vmatprep.subr.bf16.mxu0 %v2926_v10  ;;  %v449_v16 = vld [vmem:[%s2913_s21] sm:$0xff]  ;;  %v2968_v18 = vld [vmem:[%s3566_s3 + $0x30] ss:$8 sps:$4 sm:$0xff]   ;;  %v440_v20 = vshrl.u32 %v439_v19, 7  ;;  %v3029_v54 = vld [vmem:[%s3567_s4 + $0x14] ss:$8 sps:$4 sm:$0xff]  }
  0x48   : > { %526 = vmatpush1.bf16.msra.mxu0 %v2931_v11  ;;  %452 = vperm.xlu0 %2469, %v449_v16   ;;  %v411_v22 = vld [vmem:[%s3564_s1] sm:$0x3]  ;;  %v2370_v35 = vld [vmem:[%s2913_s21 + $0x8] sm:$0xff]  ;;  %v3019_v52 = vld [vmem:[#allocation4 + $0x10] ss:$8 sps:$4 sm:$0xff]   ;;  %vm521_vm0 = vcmask 523264  }
  0x49   : > { %527 = vmatprep.subr.bf16.mxu0 %v2937_v12  ;;  %v2974_v21 = vsub.s32 1, %v440_v20  ;;  %v412_v25 = vld [vmem:[%s3565_s2] sm:$0x3]  ;;  %v2995_v36 = vsub.s32 0, %v440_v20  ;;  %v3006_v48 = vld [vmem:[#allocation4 + $0x4] ss:$8 sps:$4 sm:$0xff]  }
  0x4a   : > { %v3008_v49 = vld [vmem:[#allocation4] ss:$8 sps:$4 sm:$0xff]   ;;  %v3010_v50 = vld [vmem:[#allocation4 + $0x14] ss:$8 sps:$4 sm:$0xff]   ;;  %639 = vmatprep.subr.bf16.mxu1 %v3006_v48  ;;  %v3032_v55 = vld [vmem:[#allocation4 + $0x24] ss:$8 sps:$4 sm:$0xff]  }
  0x4b   : > { %v2980_v23 = vrot.slane %v411_v22, %v2974_v21  ;;  %v2987_v27 = vrot.slane %v412_v25, %v2974_v21  ;;  %v2998_v37 = vrot.slane %v411_v22, %v2995_v36  ;;  %v3002_v39 = vrot.slane %v412_v25, %v2995_v36  ;;  %v3016_v51 = vld [vmem:[%s3567_s4 + $0x4] ss:$8 sps:$4 sm:$0xff]   ;;  %640 = vmatpush1.bf16.msra.mxu1 %v3008_v49  ;;  %v3024_v53 = vld [vmem:[%s3567_s4] ss:$8 sps:$4 sm:$0xff]   ;;  %v3039_v56 = vld [vmem:[%s3567_s4 + $0x10] ss:$8 sps:$4 sm:$0xff]  }
  0x4c   : > { %528 = vmatpush1.bf16.msra.mxu0 %v2943_v13  ;;  %641 = vmatprep.subr.bf16.mxu1 %v3010_v50  ;;  %v3045_v57 = vld [vmem:[%s3567_s4 + $0x24] ss:$8 sps:$4 sm:$0xff]   ;;  %v3051_v59 = vld [vmem:[#allocation4 + $0x34] ss:$8 sps:$4 sm:$0xff]   ;;  %v3061_v61 = vld [vmem:[#allocation4 + $0x30] ss:$8 sps:$4 sm:$0xff]  }
  0x4d   : > { %529 = vmatprep.subr.bf16.mxu0 %v2949_v14  ;;  %v3048_v58 = vld [vmem:[#allocation4 + $0x20] ss:$8 sps:$4 sm:$0xff]   ;;  %v3080_v63 = vld [vmem:[%s3567_s4 + $0x34] ss:$8 sps:$4 sm:$0xff]   ;;  %v3085_v1 = vld [vmem:[%s3567_s4 + $0x30] ss:$8 sps:$4 sm:$0xff]  }
  0x4e   : > { %v3057_v60 = vld [vmem:[%s3567_s4 + $0x20] ss:$8 sps:$4 sm:$0xff]   ;;  %p406_p9 = scmp.lt.s32.totalorder %s2853_s8, 1  ;;  %vm2257_vm1 = vcmask 7168  }
  0x4f   : > { %642 = vmatpush1.bf16.msra.mxu1 %v3019_v52 }
  0x50   : > { %530 = vmatpush1.bf16.msra.mxu0 %v2954_v15  ;;  %643 = vmatprep.subr.bf16.mxu1 %v3032_v55  ;;  %s3586_s8 = smov (!%p406_p9, %s2853_s8), 1 }
  0x51   : > { %531 = vmatprep.subr.bf16.mxu0 %v2960_v17  ;;  %s2340_s20 = sshll.u32 %s3586_s8, 3 }
  0x52   : > { %s409_s24 = scalar_lea.vmem %s3572_s9, %s2340_s20 }
  0x53   : > { %644 = vmatpush1.bf16.msra.mxu1 %v3048_v58 }
  0x54   : > { %532 = vmatpush1.bf16.msra.mxu0 %v2968_v18  ;;  %645 = vmatprep.subr.bf16.mxu1 %v3051_v59 }
  0x55   : > { %723 = vmatprep.subr.bf16.mxu0 %v3016_v51 }
  0x57   : > { %558 = vmatmul.mubr.bf16.vlgmr.msra.gmra.mrb[0].mxu0 %v2782_v9  ;;  %646 = vmatpush1.bf16.msra.mxu1 %v3061_v61 }
  0x58   : > { %755 = vmatprep.mubr.bf16.mxu0 %v2782_v9  ;;  %724 = vmatpush1.bf16.msra.mxu0 %v3024_v53 }
  0x59   : > { %725 = vmatprep.subr.bf16.mxu0 %v3029_v54  ;;  %808 = vmatprep.subr.bf16.mxu1 %v2926_v10 }
  0x5a   : > { %672 = vmatmul.mubr.bf16.vlgmr.msra.gmra.mrb[0].mxu1 %v2782_v9 }
  0x5b   : > { %809 = vmatpush1.bf16.msra.mxu1 %v2931_v11  ;;  %840 = vmatprep.mubr.bf16.mxu1 %v2782_v9 }
  0x5c   : > { %726 = vmatpush1.bf16.msra.mxu0 %v3039_v56  ;;  %810 = vmatprep.subr.bf16.mxu1 %v2937_v12 }
  0x5d   : > { %727 = vmatprep.subr.bf16.mxu0 %v3045_v57 }
  0x5f   : > { %811 = vmatpush1.bf16.msra.mxu1 %v2943_v13 }
  0x60   : > { %728 = vmatpush1.bf16.msra.mxu0 %v3057_v60  ;;  %812 = vmatprep.subr.bf16.mxu1 %v2949_v14 }
  0x61   : > { %729 = vmatprep.subr.bf16.mxu0 %v3080_v63 }
  0x63   : > { %813 = vmatpush1.bf16.msra.mxu1 %v2954_v15 }
  0x64   : > { %814 = vmatprep.subr.bf16.mxu1 %v2960_v17  ;;  %730 = vmatpush1.bf16.msra.mxu0 %v3085_v1 }
  0x65   : > { %885 = vmatprep.subr.bf16.mxu0 %v3006_v48 }
  0x67   : > { %815 = vmatpush1.bf16.msra.mxu1 %v2968_v18 }
  0x68   : > { %929 = vmatprep.subr.bf16.mxu1 %v3016_v51 }
  0xc7   : > { %v453_v24 = vpop.permute.xlu0 %452 }
  0xc8   : > { %v467_v26 = vmul.f32 %v2980_v23, %v453_v24  ;;  %v466_v38 = vmul.f32 %v2998_v37, %v453_v24 }
  0xca   : > { %v480_v28 = vadd.f32 %v2987_v27, %v467_v26  ;;  %v479_v40 = vadd.f32 %v3002_v39, %v466_v38 }
 0x12a   : > { %v559_v29 = vpop.f32.mrb[0].mxu0 }
 0x12b   : > { %v561_v30 = vpop.f32.mrb[1].mxu0  ;;  %v566_v41 = vadd.f32 %v559_v29, %v479_v40  ;;  %v437_v29 = vld [vmem:[%s3569_s6] sm:$0x3] }
 0x12c   : > { %v2990_v31 = vadd.f32 %v561_v30, %v480_v28  ;;  %v563_v32 = vpop.f32.mrb[2].mxu0 }
 0x12d   : > { %v564_v33 = vpop.f32.mrb[3].mxu0  ;;  %v2349_v42 = vmul.f32 -1.442695, %v566_v41  ;;  %v673_v7 = vpop.f32.mrb[0].mxu1  ;;  %v3120_v32 = vrot.slane %v437_v29, %v2974_v21 }
 0x12e   : > { %2507 = vtanh.f32 %v2990_v31  ;;  %v2350_v4 = vmul.f32 -1.442695, %v2990_v31  ;;  %v675_v8 = vpop.f32.mrb[1].mxu1 }
 0x12f   : > { %2509 = vpow2.f32 %v2349_v42  ;;  %v677_v16 = vpop.f32.mrb[2].mxu1 }
 0x130   : > { %v678_v19 = vpop.f32.mrb[3].mxu1 }
 0x138   : > { %v2508_v34 = vpop.eup %2507 }
 0x139   : > { %583 = vrot.lane.b32.xlu0 %v2508_v34, %s2783_s30  ;;  %v2510_v43 = vpop.eup %2509 }
 0x13a   : > { %v574_v44 = vadd.f32 1.0, %v2510_v43 }
 0x13c   : > { %2511 = vrcp.f32 %v574_v44 }
 0x13d   : > { %801 = vperm.xlu0 %2469, %v2370_v35  }
 0x146   : > { %v2512_v45 = vpop.eup %2511 }
 0x147   : > { %v581_v62 = vmul.f32 0.0, %v2512_v45 }
 0x1ab   : > { %v584_v46 = vpop.permute.xlu0 %583 }
 0x1ac   : > { %v586_v47 = vmul.f32 %v2512_v45, %v584_v46 }
 0x1ae   : > { %588 = vrot.lane.b32.xlu1 %v586_v47, %s2783_s30 }
 0x1bc   : > { %v802_v26 = vpop.permute.xlu0 %801 }
 0x1bd   : > { %v805_v28 = vmul.f32 %v802_v26, %v2980_v23 }
 0x1bf   : > { %v807_v33 = vadd.f32 %v805_v28, %v2987_v27 }
 0x220   : > { %v589_v0 = vpop.permute.xlu1 %588 }
 0x221   : > { %v3087_v2 = vadd.f32 %v589_v0, %v581_v62  ;;  %v804_v62 = vmul.f32 %v802_v26, %v2998_v37  ;;  %v3128_v0 = vrot.slane %v437_v29, %v2995_v36 }
 0x223   : > { %2513 = vtanh.f32 %v3087_v2 }
 0x224   : > { %2515 = vpow2.f32 %v2350_v4 }
 0x22d   : > { %v2514_v3 = vpop.eup %2513 }
 0x22e   : > { %594 = vrot.lane.b32.xlu1 %v2514_v3, %s2783_s30  ;;  %v2516_v5 = vpop.eup %2515  ;;  %v806_v3 = vadd.f32 %v804_v62, %v3002_v39 }
 0x22f   : > { %v575_v6 = vadd.f32 1.0, %v2516_v5 }
 0x231   : > { %2517 = vrcp.f32 %v575_v6 }
 0x23b   : > { %v2518_v20 = vpop.eup %2517 }
 0x2a0   : > { %v595_v22 = vpop.permute.xlu1 %594 }
 0x2a1   : > { %v597_v24 = vmul.f32 %v2518_v20, %v595_v22 }
 0x2a3   : > { %v598_v25 = vpack.c.bf16 %v597_v24, %v597_v24 }
 0x2a5   : > { %2367 = vmatmul.mubr.msk.bf16.vlgmr.msra.gmra.mrb[4].mxu0 %vm521_vm0, %v598_v25  ;;  %2371 = vmatmul.mubr.msk.bf16.vlgmr.msra.gmra.mrb[4].mxu1 %vm521_vm0, %v598_v25 }
 0x2a6   : > { %930 = vmatpush1.bf16.msra.mxu1 %v3024_v53  ;;  %886 = vmatpush1.bf16.msra.mxu0 %v3008_v49 }
 0x2a7   : > { %931 = vmatprep.subr.bf16.mxu1 %v3029_v54  ;;  %887 = vmatprep.subr.bf16.mxu0 %v3010_v50 }
 0x2a8   : > { %961 = vmatprep.mubr.bf16.mxu1 %v2782_v9  ;;  %917 = vmatprep.mubr.bf16.mxu0 %v2782_v9 }
 0x2aa   : > { %932 = vmatpush1.bf16.msra.mxu1 %v3039_v56  ;;  %888 = vmatpush1.bf16.msra.mxu0 %v3019_v52 }
 0x2ab   : > { %933 = vmatprep.subr.bf16.mxu1 %v3045_v57  ;;  %889 = vmatprep.subr.bf16.mxu0 %v3032_v55 }
 0x2ae   : > { %934 = vmatpush1.bf16.msra.mxu1 %v3057_v60  ;;  %890 = vmatpush1.bf16.msra.mxu0 %v3048_v58 }
 0x2af   : > { %935 = vmatprep.subr.bf16.mxu1 %v3080_v63  ;;  %891 = vmatprep.subr.bf16.mxu0 %v3051_v59 }
 0x2b2   : > { %936 = vmatpush1.bf16.msra.mxu1 %v3085_v1  ;;  %892 = vmatpush1.bf16.msra.mxu0 %v3061_v61 }
 0x2b3   : > { %1014 = vmatprep.subr.bf16.mxu0 %v2926_v10  ;;  %1091 = vmatprep.subr.bf16.mxu1 %v3006_v48 }
 0x378   : > { %v757_v30 = vpop.f32.mrb[4].mxu0  ;;  %v842_v31 = vpop.f32.mrb[4].mxu1 }
 0x379   : > { %v758_v34 = vadd.f32 %v757_v30, %v673_v7  ;;  %v759_v35 = vpop.f32.mrb[5].mxu0  ;;  %v844_v38 = vpop.f32.mrb[5].mxu1  ;;  %v849_v4 = vadd.f32 %v842_v31, %v806_v3 }
 0x37a   : > { %v760_v40 = vadd.f32 %v759_v35, %v675_v8  ;;  %v850_v41 = vadd.f32 %v844_v38, %v807_v33  ;;  %v761_v42 = vpop.f32.mrb[6].mxu0  ;;  %v846_v43 = vpop.f32.mrb[6].mxu1 }
 0x37b   : > { %v762_v44 = vpop.f32.mrb[7].mxu0  ;;  %v847_v45 = vpop.f32.mrb[7].mxu1  ;;  %v764_v5 = vadd.f32 %v758_v34, %v3128_v0  ;;  %v2372_v6 = vmul.f32 -1.442695, %v849_v4  ;;  %v2378_v42 = vld [vmem:[%s2913_s21 + $0x10] sm:$0xff] }
 0x37c   : > { %v765_v46 = vadd.f32 %v760_v40, %v3120_v32  ;;  %2519 = vtanh.f32 %v850_v41 }
 0x37d   : > { %v2368_v7 = vmul.f32 -1.442695, %v764_v5 }
 0x37e   : > { %2521 = vtanh.f32 %v765_v46  ;;  %v2369_v43 = vmul.f32 -1.442695, %v765_v46 }
 0x37f   : > { %2523 = vpow2.f32 %v2372_v6 }
 0x380   : > { %2525 = vpow2.f32 %v2368_v7 }
 0x386   : > { %v2520_v47 = vpop.eup %2519 }
 0x387   : > { %866 = vrot.lane.b32.xlu0 %v2520_v47, %s2783_s30 }
 0x388   : > { %v2522_v21 = vpop.eup %2521 }
 0x389   : > { %781 = vrot.lane.b32.xlu1 %v2522_v21, %s2783_s30  ;;  %v2524_v8 = vpop.eup %2523 }
 0x38a   : > { %v2526_v16 = vpop.eup %2525  ;;  %v857_v19 = vadd.f32 1.0, %v2524_v8 }
 0x38b   : > { %v772_v20 = vadd.f32 1.0, %v2526_v16 }
 0x38c   : > { %2527 = vrcp.f32 %v857_v19 }
 0x38d   : > { %2529 = vrcp.f32 %v772_v20 }
 0x396   : > { %v2528_v22 = vpop.eup %2527 }
 0x397   : > { %v2530_v36 = vpop.eup %2529  ;;  %v864_v29 = vmul.f32 %v2528_v22, %v3087_v2  ;;  %v2373_v2 = vmul.f32 -1.442695, %v850_v41 }
 0x398   : > { %v779_v33 = vmul.f32 0.0, %v2530_v36 }
 0x3f9   : > { %v867_v24 = vpop.permute.xlu0 %866 }
 0x3fa   : > { %v869_v25 = vmul.f32 %v2528_v22, %v867_v24 }
 0x3fb   : > { %v782_v26 = vpop.permute.xlu1 %781 }
 0x3fc   : > { %v784_v28 = vmul.f32 %v2530_v36, %v782_v26  ;;  %871 = vrot.lane.b32.xlu0 %v869_v25, %s2783_s30 }
 0x3fe   : > { %786 = vrot.lane.b32.xlu1 %v784_v28, %s2783_s30 }
 0x46e   : > { %v872_v30 = vpop.permute.xlu0 %871 }
 0x46f   : > { %v3135_v31 = vadd.f32 %v872_v30, %v864_v29 }
 0x470   : > { %v787_v34 = vpop.permute.xlu1 %786 }
 0x471   : > { %2531 = vtanh.f32 %v3135_v31  ;;  %v3138_v35 = vadd.f32 %v787_v34, %v779_v33 }
 0x473   : > { %2533 = vtanh.f32 %v3138_v35 }
 0x474   : > { %2535 = vpow2.f32 %v2373_v2 }
 0x475   : > { %2537 = vpow2.f32 %v2369_v43 }
 0x47b   : > { %v2532_v38 = vpop.eup %2531 }
 0x47c   : > { %877 = vrot.lane.b32.xlu0 %v2532_v38, %s2783_s30 }
 0x47d   : > { %v2534_v40 = vpop.eup %2533 }
 0x47e   : > { %792 = vrot.lane.b32.xlu1 %v2534_v40, %s2783_s30  ;;  %v2536_v44 = vpop.eup %2535 }
 0x47f   : > { %v2538_v45 = vpop.eup %2537  ;;  %v858_v47 = vadd.f32 1.0, %v2536_v44 }
 0x480   : > { %v773_v21 = vadd.f32 1.0, %v2538_v45 }
 0x481   : > { %2539 = vrcp.f32 %v858_v47 }
 0x482   : > { %1007 = vperm.xlu1 %2470, %v2378_v42   ;;  %2541 = vrcp.f32 %v773_v21 }
 0x48b   : > { %v2540_v62 = vpop.eup %2539 }
 0x48c   : > { %v2542_v5 = vpop.eup %2541 }
 0x4ee   : > { %v878_v3 = vpop.permute.xlu0 %877 }
 0x4ef   : > { %v880_v4 = vmul.f32 %v2540_v62, %v878_v3 }
 0x4f0   : > { %v793_v6 = vpop.permute.xlu1 %792 }
 0x4f1   : > { %v881_v7 = vpack.c.bf16 %v880_v4, %v880_v4  ;;  %v795_v8 = vmul.f32 %v2542_v5, %v793_v6 }
 0x4f3   : > { %v796_v16 = vpack.c.bf16 %v795_v8, %v795_v8  ;;  %2375 = vmatmul.mubr.msk.bf16.vlgmr.msra.gmra.mrb[8].mxu1 %vm521_vm0, %v881_v7 }
 0x4f4   : > { %1092 = vmatpush1.bf16.msra.mxu1 %v3008_v49  ;;  %1123 = vmatprep.mubr.bf16.mxu1 %v2782_v9 }
 0x4f5   : > { %2374 = vmatmul.mubr.msk.bf16.vlgmr.msra.gmra.mrb[8].mxu0 %vm521_vm0, %v796_v16  ;;  %1093 = vmatprep.subr.bf16.mxu1 %v3010_v50 }
 0x4f6   : > { %1015 = vmatpush1.bf16.msra.mxu0 %v2931_v11  ;;  %1046 = vmatprep.mubr.bf16.mxu0 %v2782_v9 }
 0x4f7   : > { %1016 = vmatprep.subr.bf16.mxu0 %v2937_v12 }
 0x4f8   : > { %1094 = vmatpush1.bf16.msra.mxu1 %v3019_v52 }
 0x4f9   : > { %1095 = vmatprep.subr.bf16.mxu1 %v3032_v55 }
 0x4fa   : > { %1017 = vmatpush1.bf16.msra.mxu0 %v2943_v13 }
 0x4fb   : > { %1018 = vmatprep.subr.bf16.mxu0 %v2949_v14 }
 0x4fc   : > { %1096 = vmatpush1.bf16.msra.mxu1 %v3048_v58 }
 0x4fd   : > { %1097 = vmatprep.subr.bf16.mxu1 %v3051_v59 }
 0x4fe   : > { %1019 = vmatpush1.bf16.msra.mxu0 %v2954_v15 }
 0x4ff   : > { %1020 = vmatprep.subr.bf16.mxu0 %v2960_v17 }
 0x500   : > { %1098 = vmatpush1.bf16.msra.mxu1 %v3061_v61 }
 0x501   : > { %1220 = vmatprep.subr.bf16.mxu1 %v2926_v10  ;;  %v1008_v30 = vpop.permute.xlu1 %1007 }
 0x502   : > { %1021 = vmatpush1.bf16.msra.mxu0 %v2968_v18  ;;  %v1011_v33 = vmul.f32 %v1008_v30, %v2980_v23  ;;  %v1010_v62 = vmul.f32 %v1008_v30, %v2998_v37  ;;  %v2386_v30 = vld [vmem:[%s2913_s21 + $0x18] sm:$0xff] }
 0x503   : > { %1135 = vmatprep.subr.bf16.mxu0 %v3016_v51 }
 0x504   : > { %v1013_v40 = vadd.f32 %v1011_v33, %v2987_v27  ;;  %v1012_v3 = vadd.f32 %v1010_v62, %v3002_v39 }
 0x505   : > { %2379 = vmatmul.mubr.msk.bf16.vlgmr.msra.gmra.mrb[12].mxu0 %vm521_vm0, %v881_v7 }
 0x506   : > { %1136 = vmatpush1.bf16.msra.mxu0 %v3024_v53  ;;  %1167 = vmatprep.mubr.bf16.mxu0 %v2782_v9 }
 0x507   : > { %1137 = vmatprep.subr.bf16.mxu0 %v3029_v54 }
 0x50a   : > { %1138 = vmatpush1.bf16.msra.mxu0 %v3039_v56 }
 0x50b   : > { %1139 = vmatprep.subr.bf16.mxu0 %v3045_v57 }
 0x50e   : > { %1140 = vmatpush1.bf16.msra.mxu0 %v3057_v60 }
 0x50f   : > { %1141 = vmatprep.subr.bf16.mxu0 %v3080_v63 }
 0x512   : > { %1142 = vmatpush1.bf16.msra.mxu0 %v3085_v1 }
 0x513   : > { %1297 = vmatprep.subr.bf16.mxu0 %v3006_v48 }
 0x5c6   : > { %v963_v41 = vpop.f32.mrb[8].mxu1 }
 0x5c7   : > { %v965_v46 = vpop.f32.mrb[9].mxu1 }
 0x5c8   : > { %v919_v19 = vpop.f32.mrb[8].mxu0  ;;  %v967_v20 = vpop.f32.mrb[10].mxu1 }
 0x5c9   : > { %v964_v22 = vadd.f32 %v963_v41, %v919_v19  ;;  %v921_v24 = vpop.f32.mrb[9].mxu0  ;;  %v968_v25 = vpop.f32.mrb[11].mxu1 }
 0x5ca   : > { %v966_v36 = vadd.f32 %v965_v46, %v921_v24  ;;  %v923_v26 = vpop.f32.mrb[10].mxu0 }
 0x5cb   : > { %v924_v28 = vpop.f32.mrb[11].mxu0  ;;  %v970_v47 = vadd.f32 %v964_v22, %v3128_v0 }
 0x5cc   : > { %v971_v29 = vadd.f32 %v966_v36, %v3120_v32 }
 0x5cd   : > { %v2376_v21 = vmul.f32 -1.442695, %v970_v47 }
 0x5ce   : > { %2543 = vtanh.f32 %v971_v29 }
 0x5d8   : > { %v2544_v34 = vpop.eup %2543  ;;  %v1048_v38 = vpop.f32.mrb[12].mxu0 }
 0x5d9   : > { %v1050_v42 = vpop.f32.mrb[13].mxu0  ;;  %987 = vrot.lane.b32.xlu0 %v2544_v34, %s2783_s30  ;;  %v1055_v5 = vadd.f32 %v1048_v38, %v1012_v3 }
 0x5da   : > { %v1052_v2 = vpop.f32.mrb[14].mxu0  ;;  %v1056_v44 = vadd.f32 %v1050_v42, %v1013_v40 }
 0x5db   : > { %v1053_v43 = vpop.f32.mrb[15].mxu0  ;;  %v2380_v7 = vmul.f32 -1.442695, %v1055_v5 }
 0x5dc   : > { %2545 = vtanh.f32 %v1056_v44  ;;  %v2381_v43 = vmul.f32 -1.442695, %v1056_v44 }
 0x5dd   : > { %2547 = vpow2.f32 %v2376_v21 }
 0x5e6   : > { %v2546_v45 = vpop.eup %2545 }
 0x5e7   : > { %1072 = vrot.lane.b32.xlu1 %v2546_v45, %s2783_s30  ;;  %v2548_v4 = vpop.eup %2547 }
 0x5e8   : > { %v978_v6 = vadd.f32 1.0, %v2548_v4 }
 0x5ea   : > { %2549 = vrcp.f32 %v978_v6 }
 0x5eb   : > { %2551 = vpow2.f32 %v2380_v7 }
 0x5f4   : > { %v2550_v8 = vpop.eup %2549 }
 0x5f5   : > { %v2552_v41 = vpop.eup %2551  ;;  %v985_v25 = vmul.f32 %v2550_v8, %v3138_v35  ;;  %v2377_v35 = vmul.f32 -1.442695, %v971_v29 }
 0x5f6   : > { %v1063_v19 = vadd.f32 1.0, %v2552_v41 }
 0x5f8   : > { %2553 = vrcp.f32 %v1063_v19 }
 0x602   : > { %v2554_v20 = vpop.eup %2553 }
 0x603   : > { %v1070_v33 = vmul.f32 %v2554_v20, %v3135_v31 }
 0x64b   : > { %v988_v16 = vpop.permute.xlu0 %987 }
 0x64c   : > { %v990_v46 = vmul.f32 %v2550_v8, %v988_v16 }
 0x64e   : > { %992 = vrot.lane.b32.xlu0 %v990_v46, %s2783_s30 }
 0x659   : > { %v1073_v22 = vpop.permute.xlu1 %1072 }
 0x65a   : > { %v1075_v24 = vmul.f32 %v2554_v20, %v1073_v22 }
 0x65c   : > { %1077 = vrot.lane.b32.xlu1 %v1075_v24, %s2783_s30 }
 0x6c0   : > { %v993_v36 = vpop.permute.xlu0 %992 }
 0x6c1   : > { %v3185_v26 = vadd.f32 %v993_v36, %v985_v25 }
 0x6c3   : > { %2555 = vtanh.f32 %v3185_v26 }
 0x6cd   : > { %v2556_v28 = vpop.eup %2555 }
 0x6ce   : > { %998 = vrot.lane.b32.xlu0 %v2556_v28, %s2783_s30  ;;  %v1078_v34 = vpop.permute.xlu1 %1077 }
 0x6cf   : > { %v3191_v38 = vadd.f32 %v1078_v34, %v1070_v33 }
 0x6d1   : > { %2557 = vtanh.f32 %v3191_v38 }
 0x6d2   : > { %1213 = vperm.xlu0 %2469, %v2386_v30   ;;  %2559 = vpow2.f32 %v2377_v35 }
 0x6db   : > { %v2558_v40 = vpop.eup %2557 }
 0x6dc   : > { %1083 = vrot.lane.b32.xlu1 %v2558_v40, %s2783_s30  ;;  %v2560_v42 = vpop.eup %2559 }
 0x6dd   : > { %v979_v2 = vadd.f32 1.0, %v2560_v42 }
 0x6df   : > { %2561 = vrcp.f32 %v979_v2 }
 0x6e0   : > { %2563 = vpow2.f32 %v2381_v43 }
 0x6e9   : > { %v2562_v45 = vpop.eup %2561 }
 0x6ea   : > { %v2564_v21 = vpop.eup %2563 }
 0x6eb   : > { %v1064_v3 = vadd.f32 1.0, %v2564_v21 }
 0x6ed   : > { %2565 = vrcp.f32 %v1064_v3 }
 0x6f7   : > { %v2566_v29 = vpop.eup %2565 }
 0x740   : > { %v999_v47 = vpop.permute.xlu0 %998 }
 0x741   : > { %v1001_v31 = vmul.f32 %v2562_v45, %v999_v47 }
 0x743   : > { %v1002_v62 = vpack.c.bf16 %v1001_v31, %v1001_v31 }
 0x745   : > { %2382 = vmatmul.mubr.msk.bf16.vlgmr.msra.gmra.mrb[12].mxu1 %vm521_vm0, %v1002_v62 }
 0x746   : > { %1221 = vmatpush1.bf16.msra.mxu1 %v2931_v11  ;;  %1252 = vmatprep.mubr.bf16.mxu1 %v2782_v9 }
 0x747   : > { %1222 = vmatprep.subr.bf16.mxu1 %v2937_v12 }
 0x74a   : > { %1223 = vmatpush1.bf16.msra.mxu1 %v2943_v13 }
 0x74b   : > { %1224 = vmatprep.subr.bf16.mxu1 %v2949_v14 }
 0x74e   : > { %1225 = vmatpush1.bf16.msra.mxu1 %v2954_v15  ;;  %v1084_v44 = vpop.permute.xlu1 %1083 }
 0x74f   : > { %1226 = vmatprep.subr.bf16.mxu1 %v2960_v17  ;;  %v1086_v4 = vmul.f32 %v2566_v29, %v1084_v44 }
 0x751   : > { %v1087_v5 = vpack.c.bf16 %v1086_v4, %v1086_v4  ;;  %v1214_v41 = vpop.permute.xlu0 %1213 }
 0x752   : > { %1227 = vmatpush1.bf16.msra.mxu1 %v2968_v18  ;;  %v1217_v46 = vmul.f32 %v1214_v41, %v2980_v23  ;;  %v1216_v45 = vmul.f32 %v1214_v41, %v2998_v37 }
 0x753   : > { %1341 = vmatprep.subr.bf16.mxu1 %v3016_v51  ;;  %2383 = vmatmul.mubr.msk.bf16.vlgmr.msra.gmra.mrb[16].mxu0 %vm521_vm0, %v1087_v5 }
 0x754   : > { %1298 = vmatpush1.bf16.msra.mxu0 %v3008_v49  ;;  %1329 = vmatprep.mubr.bf16.mxu0 %v2782_v9  ;;  %v1219_v22 = vadd.f32 %v1217_v46, %v2987_v27  ;;  %v1218_v47 = vadd.f32 %v1216_v45, %v3002_v39 }
 0x755   : > { %2387 = vmatmul.mubr.msk.bf16.vlgmr.msra.gmra.mrb[16].mxu1 %vm521_vm0, %v1087_v5  ;;  %1299 = vmatprep.subr.bf16.mxu0 %v3010_v50 }
 0x756   : > { %1342 = vmatpush1.bf16.msra.mxu1 %v3024_v53  ;;  %1373 = vmatprep.mubr.bf16.mxu1 %v2782_v9 }
 0x757   : > { %1343 = vmatprep.subr.bf16.mxu1 %v3029_v54 }
 0x758   : > { %1300 = vmatpush1.bf16.msra.mxu0 %v3019_v52 }
 0x759   : > { %1301 = vmatprep.subr.bf16.mxu0 %v3032_v55 }
 0x75a   : > { %1344 = vmatpush1.bf16.msra.mxu1 %v3039_v56 }
 0x75b   : > { %1345 = vmatprep.subr.bf16.mxu1 %v3045_v57 }
 0x75c   : > { %1302 = vmatpush1.bf16.msra.mxu0 %v3048_v58 }
 0x75d   : > { %1303 = vmatprep.subr.bf16.mxu0 %v3051_v59 }
 0x75e   : > { %1346 = vmatpush1.bf16.msra.mxu1 %v3057_v60 }
 0x75f   : > { %1347 = vmatprep.subr.bf16.mxu1 %v3080_v63 }
 0x760   : > { %1304 = vmatpush1.bf16.msra.mxu0 %v3061_v61 }
 0x761   : > { %1426 = vmatprep.subr.bf16.mxu0 %v2926_v10 }
 0x762   : > { %1348 = vmatpush1.bf16.msra.mxu1 %v3085_v1 }
 0x763   : > { %1503 = vmatprep.subr.bf16.mxu1 %v3006_v48 }
 0x818   : > { %v1125_v6 = vpop.f32.mrb[12].mxu1 }
 0x819   : > { %v1127_v7 = vpop.f32.mrb[13].mxu1 }
 0x81a   : > { %v1129_v8 = vpop.f32.mrb[14].mxu1 }
 0x81b   : > { %v1130_v16 = vpop.f32.mrb[15].mxu1 }
 0x826   : > { %v1169_v19 = vpop.f32.mrb[16].mxu0 }
 0x827   : > { %v1170_v24 = vadd.f32 %v1169_v19, %v1125_v6  ;;  %v1171_v25 = vpop.f32.mrb[17].mxu0 }
 0x828   : > { %v1254_v20 = vpop.f32.mrb[16].mxu1  ;;  %v1172_v28 = vadd.f32 %v1171_v25, %v1127_v7  ;;  %v1173_v30 = vpop.f32.mrb[18].mxu0 }
 0x829   : > { %v1256_v36 = vpop.f32.mrb[17].mxu1  ;;  %v1174_v40 = vpop.f32.mrb[19].mxu0  ;;  %v1261_v21 = vadd.f32 %v1254_v20, %v1218_v47  ;;  %v1176_v31 = vadd.f32 %v1170_v24, %v3128_v0 }
 0x82a   : > { %v1262_v33 = vadd.f32 %v1256_v36, %v1219_v22  ;;  %v1258_v34 = vpop.f32.mrb[18].mxu1  ;;  %v1177_v42 = vadd.f32 %v1172_v28, %v3120_v32 }
 0x82b   : > { %v1259_v35 = vpop.f32.mrb[19].mxu1  ;;  %v2388_v62 = vmul.f32 -1.442695, %v1261_v21  ;;  %v2384_v3 = vmul.f32 -1.442695, %v1176_v31  ;;  %v2394_v34 = vld [vmem:[%s2913_s21 + $0x20] sm:$0xff] }
 0x82c   : > { %2567 = vtanh.f32 %v1262_v33  ;;  %v2385_v40 = vmul.f32 -1.442695, %v1177_v42 }
 0x82d   : > { %2569 = vtanh.f32 %v1177_v42 }
 0x82e   : > { %2571 = vpow2.f32 %v2388_v62 }
 0x82f   : > { %2573 = vpow2.f32 %v2384_v3 }
 0x836   : > { %v2568_v2 = vpop.eup %2567 }
 0x837   : > { %1278 = vrot.lane.b32.xlu0 %v2568_v2, %s2783_s30  ;;  %v2570_v43 = vpop.eup %2569 }
 0x838   : > { %1193 = vrot.lane.b32.xlu1 %v2570_v43, %s2783_s30  ;;  %v2572_v29 = vpop.eup %2571 }
 0x839   : > { %v2574_v44 = vpop.eup %2573  ;;  %v1269_v4 = vadd.f32 1.0, %v2572_v29 }
 0x83a   : > { %v1184_v5 = vadd.f32 1.0, %v2574_v44 }
 0x83b   : > { %2575 = vrcp.f32 %v1269_v4 }
 0x83c   : > { %2577 = vrcp.f32 %v1184_v5 }
 0x845   : > { %v2576_v6 = vpop.eup %2575 }
 0x846   : > { %v2578_v16 = vpop.eup %2577  ;;  %v1276_v19 = vmul.f32 %v2576_v6, %v3191_v38  ;;  %v2389_v38 = vmul.f32 -1.442695, %v1262_v33 }
 0x847   : > { %v1191_v24 = vmul.f32 %v2578_v16, %v3185_v26 }
 0x8a9   : > { %v1279_v7 = vpop.permute.xlu0 %1278 }
 0x8aa   : > { %v1281_v8 = vmul.f32 %v2576_v6, %v1279_v7  ;;  %v1194_v41 = vpop.permute.xlu1 %1193 }
 0x8ab   : > { %v1196_v46 = vmul.f32 %v2578_v16, %v1194_v41 }
 0x8ac   : > { %1283 = vrot.lane.b32.xlu0 %v1281_v8, %s2783_s30 }
 0x8ad   : > { %1198 = vrot.lane.b32.xlu1 %v1196_v46, %s2783_s30 }
 0x91e   : > { %v1284_v20 = vpop.permute.xlu0 %1283 }
 0x91f   : > { %v3236_v22 = vadd.f32 %v1284_v20, %v1276_v19  ;;  %v1199_v25 = vpop.permute.xlu1 %1198 }
 0x920   : > { %v3240_v36 = vadd.f32 %v1199_v25, %v1191_v24 }
 0x921   : > { %2579 = vtanh.f32 %v3236_v22 }
 0x922   : > { %2581 = vtanh.f32 %v3240_v36 }
 0x923   : > { %2583 = vpow2.f32 %v2389_v38 }
 0x924   : > { %2585 = vpow2.f32 %v2385_v40 }
 0x92b   : > { %v2580_v28 = vpop.eup %2579 }
 0x92c   : > { %1289 = vrot.lane.b32.xlu0 %v2580_v28, %s2783_s30  ;;  %v2582_v30 = vpop.eup %2581 }
 0x92d   : > { %1204 = vrot.lane.b32.xlu1 %v2582_v30, %s2783_s30  ;;  %v2584_v26 = vpop.eup %2583 }
 0x92e   : > { %v2586_v35 = vpop.eup %2585  ;;  %v1270_v2 = vadd.f32 1.0, %v2584_v26 }
 0x92f   : > { %v1185_v43 = vadd.f32 1.0, %v2586_v35 }
 0x930   : > { %2587 = vrcp.f32 %v1270_v2 }
 0x931   : > { %1419 = vperm.xlu1 %2470, %v2394_v34   ;;  %2589 = vrcp.f32 %v1185_v43 }
 0x93a   : > { %v2588_v45 = vpop.eup %2587 }
 0x93b   : > { %v2590_v31 = vpop.eup %2589 }
 0x99e   : > { %v1290_v47 = vpop.permute.xlu0 %1289 }
 0x99f   : > { %v1292_v21 = vmul.f32 %v2588_v45, %v1290_v47  ;;  %v1205_v62 = vpop.permute.xlu1 %1204 }
 0x9a0   : > { %v1207_v29 = vmul.f32 %v2590_v31, %v1205_v62 }
 0x9a1   : > { %v1293_v3 = vpack.c.bf16 %v1292_v21, %v1292_v21 }
 0x9a2   : > { %v1208_v44 = vpack.c.bf16 %v1207_v29, %v1207_v29 }
 0x9a3   : > { %2391 = vmatmul.mubr.msk.bf16.vlgmr.msra.gmra.mrb[20].mxu1 %vm521_vm0, %v1293_v3 }
 0x9a4   : > { %1504 = vmatpush1.bf16.msra.mxu1 %v3008_v49  ;;  %1535 = vmatprep.mubr.bf16.mxu1 %v2782_v9 }
 0x9a5   : > { %2390 = vmatmul.mubr.msk.bf16.vlgmr.msra.gmra.mrb[20].mxu0 %vm521_vm0, %v1208_v44  ;;  %1505 = vmatprep.subr.bf16.mxu1 %v3010_v50 }
 0x9a6   : > { %1427 = vmatpush1.bf16.msra.mxu0 %v2931_v11  ;;  %1458 = vmatprep.mubr.bf16.mxu0 %v2782_v9 }
 0x9a7   : > { %1428 = vmatprep.subr.bf16.mxu0 %v2937_v12 }
 0x9a8   : > { %1506 = vmatpush1.bf16.msra.mxu1 %v3019_v52 }
 0x9a9   : > { %1507 = vmatprep.subr.bf16.mxu1 %v3032_v55 }
 0x9aa   : > { %1429 = vmatpush1.bf16.msra.mxu0 %v2943_v13 }
 0x9ab   : > { %1430 = vmatprep.subr.bf16.mxu0 %v2949_v14 }
 0x9ac   : > { %1508 = vmatpush1.bf16.msra.mxu1 %v3048_v58 }
 0x9ad   : > { %1509 = vmatprep.subr.bf16.mxu1 %v3051_v59 }
 0x9ae   : > { %1431 = vmatpush1.bf16.msra.mxu0 %v2954_v15 }
 0x9af   : > { %1432 = vmatprep.subr.bf16.mxu0 %v2960_v17 }
 0x9b0   : > { %1510 = vmatpush1.bf16.msra.mxu1 %v3061_v61  ;;  %v1420_v5 = vpop.permute.xlu1 %1419 }
 0x9b1   : > { %1632 = vmatprep.subr.bf16.mxu1 %v2926_v10  ;;  %v1423_v6 = vmul.f32 %v1420_v5, %v2980_v23  ;;  %v1422_v28 = vmul.f32 %v1420_v5, %v2998_v37 }
 0x9b2   : > { %1433 = vmatpush1.bf16.msra.mxu0 %v2968_v18 }
 0x9b3   : > { %1547 = vmatprep.subr.bf16.mxu0 %v3016_v51  ;;  %v1424_v30 = vadd.f32 %v1422_v28, %v3002_v39 }
 0x9b5   : > { %2395 = vmatmul.mubr.msk.bf16.vlgmr.msra.gmra.mrb[24].mxu0 %vm521_vm0, %v1293_v3 }
 0x9b6   : > { %1548 = vmatpush1.bf16.msra.mxu0 %v3024_v53  ;;  %1579 = vmatprep.mubr.bf16.mxu0 %v2782_v9 }
 0x9b7   : > { %1549 = vmatprep.subr.bf16.mxu0 %v3029_v54 }
 0x9ba   : > { %1550 = vmatpush1.bf16.msra.mxu0 %v3039_v56 }
 0x9bb   : > { %1551 = vmatprep.subr.bf16.mxu0 %v3045_v57 }
 0x9be   : > { %1552 = vmatpush1.bf16.msra.mxu0 %v3057_v60 }
 0x9bf   : > { %1553 = vmatprep.subr.bf16.mxu0 %v3080_v63 }
 0x9c2   : > { %1554 = vmatpush1.bf16.msra.mxu0 %v3085_v1 }
 0x9c3   : > { %1709 = vmatprep.subr.bf16.mxu0 %v3006_v48  ;;  %v1425_v48 = vadd.f32 %v1423_v6, %v2987_v27 }
 0xa76   : > { %v1375_v10 = vpop.f32.mrb[20].mxu1 }
 0xa77   : > { %v1377_v11 = vpop.f32.mrb[21].mxu1 }
 0xa78   : > { %v1331_v12 = vpop.f32.mrb[20].mxu0  ;;  %v1379_v13 = vpop.f32.mrb[22].mxu1 }
 0xa79   : > { %v1376_v14 = vadd.f32 %v1375_v10, %v1331_v12  ;;  %v1333_v15 = vpop.f32.mrb[21].mxu0  ;;  %v1380_v17 = vpop.f32.mrb[23].mxu1 }
 0xa7a   : > { %v1378_v18 = vadd.f32 %v1377_v11, %v1333_v15  ;;  %v1335_v33 = vpop.f32.mrb[22].mxu0  ;;  %v2402_v11 = vld [vmem:[%s2913_s21 + $0x28] sm:$0xff] }
 0xa7b   : > { %v1336_v42 = vpop.f32.mrb[23].mxu0  ;;  %v1382_v24 = vadd.f32 %v1376_v14, %v3128_v0 }
 0xa7c   : > { %v1383_v4 = vadd.f32 %v1378_v18, %v3120_v32 }
 0xa7d   : > { %v2392_v25 = vmul.f32 -1.442695, %v1382_v24 }
 0xa7e   : > { %2591 = vtanh.f32 %v1383_v4 }
 0xa88   : > { %v2592_v7 = vpop.eup %2591  ;;  %v1460_v8 = vpop.f32.mrb[24].mxu0 }
 0xa89   : > { %v1462_v16 = vpop.f32.mrb[25].mxu0  ;;  %1399 = vrot.lane.b32.xlu0 %v2592_v7, %s2783_s30  ;;  %v1467_v38 = vadd.f32 %v1460_v8, %v1424_v30 }
 0xa8a   : > { %v1464_v41 = vpop.f32.mrb[26].mxu0  ;;  %v1468_v19 = vadd.f32 %v1462_v16, %v1425_v48  ;;  %v3301_v16 = vld [vmem:[%s3566_s3] ss:$8 sps:$4 sm:$0xff]   ;;  %v3314_v48 = vld [vmem:[%s3566_s3 + $0x10] ss:$8 sps:$4 sm:$0xff]  }
 0xa8b   : > { %v1465_v46 = vpop.f32.mrb[27].mxu0  ;;  %v2396_v26 = vmul.f32 -1.442695, %v1467_v38  ;;  %v3320_v41 = vld [vmem:[%s3566_s3 + $0x24] ss:$8 sps:$4 sm:$0xff]  }
 0xa8c   : > { %2593 = vtanh.f32 %v1468_v19  ;;  %v2397_v33 = vmul.f32 -1.442695, %v1468_v19  ;;  %v3326_v46 = vld [vmem:[%s3566_s3 + $0x20] ss:$8 sps:$4 sm:$0xff]   ;;  %v3332_v19 = vld [vmem:[%s3566_s3 + $0x34] ss:$8 sps:$4 sm:$0xff]  }
 0xa8d   : > { %2595 = vpow2.f32 %v2392_v25  ;;  %v3338_v25 = vld [vmem:[%s3566_s3 + $0x30] ss:$8 sps:$4 sm:$0xff]  }
 0xa96   : > { %v2594_v20 = vpop.eup %2593 }
 0xa97   : > { %1484 = vrot.lane.b32.xlu1 %v2594_v20, %s2783_s30  ;;  %v2596_v34 = vpop.eup %2595 }
 0xa98   : > { %v1390_v40 = vadd.f32 1.0, %v2596_v34 }
 0xa9a   : > { %2597 = vrcp.f32 %v1390_v40 }
 0xa9b   : > { %2599 = vpow2.f32 %v2396_v26 }
 0xaa4   : > { %v2598_v35 = vpop.eup %2597 }
 0xaa5   : > { %v2600_v43 = vpop.eup %2599  ;;  %v1397_v3 = vmul.f32 %v2598_v35, %v3240_v36  ;;  %v2393_v36 = vmul.f32 -1.442695, %v1383_v4  ;;  %v3308_v4 = vld [vmem:[%s3566_s3 + $0x14] ss:$8 sps:$4 sm:$0xff]  }
 0xaa6   : > { %v1475_v47 = vadd.f32 1.0, %v2600_v43 }
 0xaa8   : > { %2601 = vrcp.f32 %v1475_v47 }
 0xab2   : > { %v2602_v21 = vpop.eup %2601 }
 0xab3   : > { %v1482_v12 = vmul.f32 %v2602_v21, %v3236_v22 }
 0xafb   : > { %v1400_v2 = vpop.permute.xlu0 %1399 }
 0xafc   : > { %v1402_v45 = vmul.f32 %v2598_v35, %v1400_v2 }
 0xafe   : > { %1404 = vrot.lane.b32.xlu0 %v1402_v45, %s2783_s30 }
 0xb09   : > { %v1485_v31 = vpop.permute.xlu1 %1484 }
 0xb0a   : > { %v1487_v62 = vmul.f32 %v2602_v21, %v1485_v31 }
 0xb0c   : > { %1489 = vrot.lane.b32.xlu1 %v1487_v62, %s2783_s30 }
 0xb70   : > { %v1405_v29 = vpop.permute.xlu0 %1404 }
 0xb71   : > { %v3287_v44 = vadd.f32 %v1405_v29, %v1397_v3 }
 0xb73   : > { %2603 = vtanh.f32 %v3287_v44 }
 0xb7d   : > { %v2604_v10 = vpop.eup %2603 }
 0xb7e   : > { %1410 = vrot.lane.b32.xlu0 %v2604_v10, %s2783_s30  ;;  %v1490_v13 = vpop.permute.xlu1 %1489 }
 0xb7f   : > { %v3293_v14 = vadd.f32 %v1490_v13, %v1482_v12 }
 0xb81   : > { %2605 = vtanh.f32 %v3293_v14 }
 0xb82   : > { %1625 = vperm.xlu0 %2469, %v2402_v11   ;;  %2607 = vpow2.f32 %v2393_v36 }
 0xb8b   : > { %v2606_v15 = vpop.eup %2605 }
 0xb8c   : > { %1495 = vrot.lane.b32.xlu1 %v2606_v15, %s2783_s30  ;;  %v2608_v17 = vpop.eup %2607 }
 0xb8d   : > { %v1391_v18 = vadd.f32 1.0, %v2608_v17 }
 0xb8f   : > { %2609 = vrcp.f32 %v1391_v18 }
 0xb90   : > { %2611 = vpow2.f32 %v2397_v33 }
 0xb99   : > { %v2610_v42 = vpop.eup %2609 }
 0xb9a   : > { %v2612_v6 = vpop.eup %2611 }
 0xb9b   : > { %v1476_v8 = vadd.f32 1.0, %v2612_v6 }
 0xb9d   : > { %2613 = vrcp.f32 %v1476_v8 }
 0xba7   : > { %v2614_v20 = vpop.eup %2613 }
 0xbf0   : > { %v1411_v5 = vpop.permute.xlu0 %1410 }
 0xbf1   : > { %v1413_v22 = vmul.f32 %v2610_v42, %v1411_v5 }
 0xbf3   : > { %v1414_v7 = vpack.c.bf16 %v1413_v22, %v1413_v22 }
 0xbf5   : > { %2398 = vmatmul.mubr.msk.bf16.vlgmr.msra.gmra.mrb[24].mxu1 %vm521_vm0, %v1414_v7 }
 0xbf6   : > { %1633 = vmatpush1.bf16.msra.mxu1 %v3301_v16  ;;  %1664 = vmatprep.mubr.bf16.mxu1 %v2782_v9 }
 0xbf7   : > { %1634 = vmatprep.subr.bf16.mxu1 %v3308_v4 }
 0xbfa   : > { %1635 = vmatpush1.bf16.msra.mxu1 %v3314_v48 }
 0xbfb   : > { %1636 = vmatprep.subr.bf16.mxu1 %v3320_v41 }
 0xbfe   : > { %1637 = vmatpush1.bf16.msra.mxu1 %v3326_v46  ;;  %v1496_v24 = vpop.permute.xlu1 %1495 }
 0xbff   : > { %1638 = vmatprep.subr.bf16.mxu1 %v3332_v19  ;;  %v1498_v28 = vmul.f32 %v2614_v20, %v1496_v24 }
 0xc01   : > { %v1499_v30 = vpack.c.bf16 %v1498_v28, %v1498_v28 }
 0xc02   : > { %1639 = vmatpush1.bf16.msra.mxu1 %v3338_v25 }
 0xc03   : > { %1753 = vmatprep.subr.bf16.mxu1 %v3016_v51  ;;  %2399 = vmatmul.mubr.msk.bf16.vlgmr.msra.gmra.mrb[28].mxu0 %vm521_vm0, %v1499_v30 }
 0xc04   : > { %1710 = vmatpush1.bf16.msra.mxu0 %v3008_v49  ;;  %1741 = vmatprep.mubr.bf16.mxu0 %v2782_v9  ;;  %v3363_v49 = vld [vmem:[%s3566_s3 + $0x4] ss:$8 sps:$4 sm:$0xff]  }
 0xc05   : > { %2403 = vmatmul.mubr.msk.bf16.vlgmr.msra.gmra.mrb[28].mxu1 %vm521_vm0, %v1499_v30  ;;  %1711 = vmatprep.subr.bf16.mxu0 %v3010_v50  ;;  %v3366_v50 = vld [vmem:[#allocation4 + $0x4] ss:$8 sps:$4 sm:$0xff]   ;;  %v2410_v30 = vld [vmem:[%s2913_s21 + $0x30] sm:$0xff] }
 0xc06   : > { %1754 = vmatpush1.bf16.msra.mxu1 %v3024_v53  ;;  %1785 = vmatprep.mubr.bf16.mxu1 %v2782_v9 }
 0xc07   : > { %1755 = vmatprep.subr.bf16.mxu1 %v3029_v54 }
 0xc08   : > { %1712 = vmatpush1.bf16.msra.mxu0 %v3019_v52 }
 0xc09   : > { %1713 = vmatprep.subr.bf16.mxu0 %v3032_v55  ;;  %v1626_v55 = vpop.permute.xlu0 %1625 }
 0xc0a   : > { %1756 = vmatpush1.bf16.msra.mxu1 %v3039_v56  ;;  %v1629_v56 = vmul.f32 %v1626_v55, %v2980_v23  ;;  %v1628_v47 = vmul.f32 %v1626_v55, %v2998_v37 }
 0xc0b   : > { %1757 = vmatprep.subr.bf16.mxu1 %v3045_v57 }
 0xc0c   : > { %1714 = vmatpush1.bf16.msra.mxu0 %v3048_v58  ;;  %v1630_v21 = vadd.f32 %v1628_v47, %v3002_v39  ;;  %v3446_v47 = vld [vmem:[%s3567_s4 + $0x10] ss:$8 sps:$4 sm:$0xff]  }
 0xc0d   : > { %1715 = vmatprep.subr.bf16.mxu0 %v3051_v59  ;;  %v1631_v59 = vadd.f32 %v1629_v56, %v2987_v27 }
 0xc0e   : > { %1758 = vmatpush1.bf16.msra.mxu1 %v3057_v60 }
 0xc0f   : > { %1759 = vmatprep.subr.bf16.mxu1 %v3080_v63 }
 0xc10   : > { %1716 = vmatpush1.bf16.msra.mxu0 %v3061_v61 }
 0xc11   : > { %1838 = vmatprep.subr.bf16.mxu0 %v3363_v49 }
 0xc12   : > { %1760 = vmatpush1.bf16.msra.mxu1 %v3085_v1 }
 0xc13   : > { %1915 = vmatprep.subr.bf16.mxu1 %v3366_v50 }
 0xcc8   : > { %v1537_v51 = vpop.f32.mrb[24].mxu1 }
 0xcc9   : > { %v1539_v52 = vpop.f32.mrb[25].mxu1 }
 0xcca   : > { %v1541_v53 = vpop.f32.mrb[26].mxu1 }
 0xccb   : > { %v1542_v54 = vpop.f32.mrb[27].mxu1 }
 0xcd6   : > { %v1581_v57 = vpop.f32.mrb[28].mxu0 }
 0xcd7   : > { %v1582_v60 = vadd.f32 %v1581_v57, %v1537_v51  ;;  %v1583_v61 = vpop.f32.mrb[29].mxu0 }
 0xcd8   : > { %v1666_v58 = vpop.f32.mrb[28].mxu1  ;;  %v1584_v1 = vadd.f32 %v1583_v61, %v1539_v52  ;;  %v1585_v34 = vpop.f32.mrb[30].mxu0 }
 0xcd9   : > { %v1668_v63 = vpop.f32.mrb[29].mxu1  ;;  %v1586_v26 = vpop.f32.mrb[31].mxu0  ;;  %v1673_v31 = vadd.f32 %v1666_v58, %v1630_v21  ;;  %v1588_v62 = vadd.f32 %v1582_v60, %v3128_v0  ;;  %v3396_v34 = vld [vmem:[#allocation4 + $0x14] ss:$8 sps:$4 sm:$0xff]   ;;  %v3452_v21 = vld [vmem:[%s3567_s4 + $0x24] ss:$8 sps:$4 sm:$0xff]  }
 0xcda   : > { %v1674_v38 = vadd.f32 %v1668_v63, %v1631_v59  ;;  %v1670_v40 = vpop.f32.mrb[30].mxu1  ;;  %v1589_v2 = vadd.f32 %v1584_v1, %v3120_v32  ;;  %v3391_v1 = vld [vmem:[#allocation4] ss:$8 sps:$4 sm:$0xff]  }
 0xcdb   : > { %v1671_v35 = vpop.f32.mrb[31].mxu1  ;;  %v2404_v3 = vmul.f32 -1.442695, %v1673_v31  ;;  %v2400_v29 = vmul.f32 -1.442695, %v1588_v62 }
 0xcdc   : > { %2615 = vtanh.f32 %v1674_v38  ;;  %v2401_v51 = vmul.f32 -1.442695, %v1589_v2  ;;  %v3405_v40 = vld [vmem:[#allocation4 + $0x24] ss:$8 sps:$4 sm:$0xff]   ;;  %v3410_v26 = vld [vmem:[#allocation4 + $0x20] ss:$8 sps:$4 sm:$0xff]  }
 0xcdd   : > { %2617 = vtanh.f32 %v1589_v2  ;;  %v3413_v35 = vld [vmem:[#allocation4 + $0x34] ss:$8 sps:$4 sm:$0xff]   ;;  %v3418_v2 = vld [vmem:[#allocation4 + $0x30] ss:$8 sps:$4 sm:$0xff]  }
 0xcde   : > { %2619 = vpow2.f32 %v2404_v3  ;;  %v3458_v31 = vld [vmem:[%s3567_s4 + $0x20] ss:$8 sps:$4 sm:$0xff]   ;;  %v3464_v62 = vld [vmem:[%s3567_s4 + $0x34] ss:$8 sps:$4 sm:$0xff]   ;;  %v3470_v3 = vld [vmem:[%s3567_s4 + $0x30] ss:$8 sps:$4 sm:$0xff]  }
 0xcdf   : > { %2621 = vpow2.f32 %v2400_v29 }
 0xce6   : > { %v2616_v43 = vpop.eup %2615 }
 0xce7   : > { %1690 = vrot.lane.b32.xlu0 %v2616_v43, %s2783_s30  ;;  %v2618_v45 = vpop.eup %2617  ;;  %v3426_v43 = vld [vmem:[%s3567_s4 + $0x4] ss:$8 sps:$4 sm:$0xff]  }
 0xce8   : > { %1605 = vrot.lane.b32.xlu1 %v2618_v45, %s2783_s30  ;;  %v2620_v10 = vpop.eup %2619  ;;  %v3433_v45 = vld [vmem:[%s3567_s4] ss:$8 sps:$4 sm:$0xff]  }
 0xce9   : > { %v2622_v11 = vpop.eup %2621  ;;  %v1681_v12 = vadd.f32 1.0, %v2620_v10 }
 0xcea   : > { %v1596_v13 = vadd.f32 1.0, %v2622_v11 }
 0xceb   : > { %2623 = vrcp.f32 %v1681_v12 }
 0xcec   : > { %2625 = vrcp.f32 %v1596_v13 }
 0xcf5   : > { %v2624_v15 = vpop.eup %2623 }
 0xcf6   : > { %v2626_v18 = vpop.eup %2625  ;;  %v1688_v5 = vmul.f32 %v2624_v15, %v3293_v14  ;;  %v2405_v14 = vmul.f32 -1.442695, %v1674_v38  ;;  %v3402_v38 = vld [vmem:[#allocation4 + $0x10] ss:$8 sps:$4 sm:$0xff]  }
 0xcf7   : > { %v1603_v7 = vmul.f32 %v2626_v18, %v3287_v44 }
 0xd59   : > { %v1691_v36 = vpop.permute.xlu0 %1690 }
 0xd5a   : > { %v1693_v17 = vmul.f32 %v2624_v15, %v1691_v36  ;;  %v1606_v33 = vpop.permute.xlu1 %1605 }
 0xd5b   : > { %v1608_v42 = vmul.f32 %v2626_v18, %v1606_v33 }
 0xd5c   : > { %1695 = vrot.lane.b32.xlu0 %v1693_v17, %s2783_s30 }
 0xd5d   : > { %1610 = vrot.lane.b32.xlu1 %v1608_v42, %s2783_s30 }
 0xdce   : > { %v1696_v6 = vpop.permute.xlu0 %1695 }
 0xdcf   : > { %v3380_v22 = vadd.f32 %v1696_v6, %v1688_v5  ;;  %v1611_v8 = vpop.permute.xlu1 %1610 }
 0xdd0   : > { %v3384_v20 = vadd.f32 %v1611_v8, %v1603_v7 }
 0xdd1   : > { %2627 = vtanh.f32 %v3380_v22 }
 0xdd2   : > { %2629 = vtanh.f32 %v3384_v20 }
 0xdd3   : > { %2631 = vpow2.f32 %v2405_v14 }
 0xdd4   : > { %2633 = vpow2.f32 %v2401_v51 }
 0xddb   : > { %v2628_v24 = vpop.eup %2627 }
 0xddc   : > { %1701 = vrot.lane.b32.xlu0 %v2628_v24, %s2783_s30  ;;  %v2630_v28 = vpop.eup %2629 }
 0xddd   : > { %1616 = vrot.lane.b32.xlu1 %v2630_v28, %s2783_s30  ;;  %v2632_v44 = vpop.eup %2631 }
 0xdde   : > { %v2634_v52 = vpop.eup %2633  ;;  %v1682_v53 = vadd.f32 1.0, %v2632_v44 }
 0xddf   : > { %v1597_v54 = vadd.f32 1.0, %v2634_v52 }
 0xde0   : > { %2635 = vrcp.f32 %v1682_v53 }
 0xde1   : > { %1831 = vperm.xlu1 %2470, %v2410_v30   ;;  %2637 = vrcp.f32 %v1597_v54 }
 0xdea   : > { %v2636_v55 = vpop.eup %2635 }
 0xdeb   : > { %v2638_v58 = vpop.eup %2637 }
 0xe4e   : > { %v1702_v56 = vpop.permute.xlu0 %1701 }
 0xe4f   : > { %v1704_v57 = vmul.f32 %v2636_v55, %v1702_v56  ;;  %v1617_v59 = vpop.permute.xlu1 %1616 }
 0xe50   : > { %v1619_v61 = vmul.f32 %v2638_v58, %v1617_v59 }
 0xe51   : > { %v1705_v60 = vpack.c.bf16 %v1704_v57, %v1704_v57 }
 0xe52   : > { %v1620_v63 = vpack.c.bf16 %v1619_v61, %v1619_v61 }
 0xe53   : > { %2407 = vmatmul.mubr.msk.bf16.vlgmr.msra.gmra.mrb[32].mxu1 %vm521_vm0, %v1705_v60 }
 0xe54   : > { %1916 = vmatpush1.bf16.msra.mxu1 %v3391_v1  ;;  %1947 = vmatprep.mubr.bf16.mxu1 %v2782_v9 }
 0xe55   : > { %2406 = vmatmul.mubr.msk.bf16.vlgmr.msra.gmra.mrb[32].mxu0 %vm521_vm0, %v1620_v63  ;;  %1917 = vmatprep.subr.bf16.mxu1 %v3396_v34 }
 0xe56   : > { %1839 = vmatpush1.bf16.msra.mxu0 %v3301_v16  ;;  %1870 = vmatprep.mubr.bf16.mxu0 %v2782_v9 }
 0xe57   : > { %1840 = vmatprep.subr.bf16.mxu0 %v3308_v4 }
 0xe58   : > { %1918 = vmatpush1.bf16.msra.mxu1 %v3402_v38 }
 0xe59   : > { %1919 = vmatprep.subr.bf16.mxu1 %v3405_v40 }
 0xe5a   : > { %1841 = vmatpush1.bf16.msra.mxu0 %v3314_v48 }
 0xe5b   : > { %1842 = vmatprep.subr.bf16.mxu0 %v3320_v41 }
 0xe5c   : > { %1920 = vmatpush1.bf16.msra.mxu1 %v3410_v26 }
 0xe5d   : > { %1921 = vmatprep.subr.bf16.mxu1 %v3413_v35 }
 0xe5e   : > { %1843 = vmatpush1.bf16.msra.mxu0 %v3326_v46 }
 0xe5f   : > { %1844 = vmatprep.subr.bf16.mxu0 %v3332_v19 }
 0xe60   : > { %1922 = vmatpush1.bf16.msra.mxu1 %v3418_v2  ;;  %v1832_v5 = vpop.permute.xlu1 %1831 }
 0xe61   : > { %2044 = vmatprep.subr.bf16.mxu1 %v3363_v49  ;;  %v3440_v49 = vld [vmem:[%s3567_s4 + $0x14] ss:$8 sps:$4 sm:$0xff]   ;;  %v1835_v6 = vmul.f32 %v1832_v5, %v2980_v23  ;;  %v1834_v53 = vmul.f32 %v1832_v5, %v2998_v37 }
 0xe62   : > { %1845 = vmatpush1.bf16.msra.mxu0 %v3338_v25 }
 0xe63   : > { %1959 = vmatprep.subr.bf16.mxu0 %v3426_v43  ;;  %v1836_v54 = vadd.f32 %v1834_v53, %v3002_v39 }
 0xe65   : > { %2411 = vmatmul.mubr.msk.bf16.vlgmr.msra.gmra.mrb[36].mxu0 %vm521_vm0, %v1705_v60 }
 0xe66   : > { %1960 = vmatpush1.bf16.msra.mxu0 %v3433_v45  ;;  %1991 = vmatprep.mubr.bf16.mxu0 %v2782_v9 }
 0xe67   : > { %1961 = vmatprep.subr.bf16.mxu0 %v3440_v49 }
 0xe6a   : > { %1962 = vmatpush1.bf16.msra.mxu0 %v3446_v47 }
 0xe6b   : > { %1963 = vmatprep.subr.bf16.mxu0 %v3452_v21 }
 0xe6e   : > { %1964 = vmatpush1.bf16.msra.mxu0 %v3458_v31 }
 0xe6f   : > { %1965 = vmatprep.subr.bf16.mxu0 %v3464_v62 }
 0xe72   : > { %1966 = vmatpush1.bf16.msra.mxu0 %v3470_v3 }
 0xe73   : > { %2121 = vmatprep.subr.bf16.mxu0 %v3366_v50  ;;  %v1837_v50 = vadd.f32 %v1835_v6, %v2987_v27 }
 0xf26   : > { %v1787_v29 = vpop.f32.mrb[32].mxu1 }
 0xf27   : > { %v1789_v10 = vpop.f32.mrb[33].mxu1 }
 0xf28   : > { %v1743_v11 = vpop.f32.mrb[32].mxu0  ;;  %v1791_v12 = vpop.f32.mrb[34].mxu1 }
 0xf29   : > { %v1788_v13 = vadd.f32 %v1787_v29, %v1743_v11  ;;  %v1745_v15 = vpop.f32.mrb[33].mxu0  ;;  %v1792_v36 = vpop.f32.mrb[35].mxu1 }
 0xf2a   : > { %v1790_v17 = vadd.f32 %v1789_v10, %v1745_v15  ;;  %v1747_v18 = vpop.f32.mrb[34].mxu0 }
 0xf2b   : > { %v1748_v33 = vpop.f32.mrb[35].mxu0  ;;  %v1794_v44 = vadd.f32 %v1788_v13, %v3128_v0  ;;  %v2418_v18 = vld [vmem:[%s2913_s21 + $0x38] sm:$0xff] }
 0xf2c   : > { %v1795_v42 = vadd.f32 %v1790_v17, %v3120_v32 }
 0xf2d   : > { %v2408_v52 = vmul.f32 -1.442695, %v1794_v44 }
 0xf2e   : > { %2639 = vtanh.f32 %v1795_v42 }
 0xf38   : > { %v2640_v7 = vpop.eup %2639  ;;  %v1872_v8 = vpop.f32.mrb[36].mxu0 }
 0xf39   : > { %v1874_v24 = vpop.f32.mrb[37].mxu0  ;;  %1811 = vrot.lane.b32.xlu0 %v2640_v7, %s2783_s30  ;;  %v1879_v56 = vadd.f32 %v1872_v8, %v1836_v54 }
 0xf3a   : > { %v1876_v28 = vpop.f32.mrb[38].mxu0  ;;  %v1880_v14 = vadd.f32 %v1874_v24, %v1837_v50 }
 0xf3b   : > { %v1877_v30 = vpop.f32.mrb[39].mxu0  ;;  %v2412_v58 = vmul.f32 -1.442695, %v1879_v56 }
 0xf3c   : > { %2641 = vtanh.f32 %v1880_v14  ;;  %v2413_v50 = vmul.f32 -1.442695, %v1880_v14 }
 0xf3d   : > { %2643 = vpow2.f32 %v2408_v52 }
 0xf46   : > { %v2642_v51 = vpop.eup %2641 }
 0xf47   : > { %1896 = vrot.lane.b32.xlu1 %v2642_v51, %s2783_s30  ;;  %v2644_v55 = vpop.eup %2643 }
 0xf48   : > { %v1802_v57 = vadd.f32 1.0, %v2644_v55 }
 0xf4a   : > { %2645 = vrcp.f32 %v1802_v57 }
 0xf4b   : > { %2647 = vpow2.f32 %v2412_v58 }
 0xf54   : > { %v2646_v59 = vpop.eup %2645 }
 0xf55   : > { %v2648_v61 = vpop.eup %2647  ;;  %v1809_v13 = vmul.f32 %v2646_v59, %v3384_v20  ;;  %v2409_v20 = vmul.f32 -1.442695, %v1795_v42 }
 0xf56   : > { %v1887_v29 = vadd.f32 1.0, %v2648_v61 }
 0xf58   : > { %2649 = vrcp.f32 %v1887_v29 }
 0xf62   : > { %v2650_v10 = vpop.eup %2649 }
 0xf63   : > { %v1894_v33 = vmul.f32 %v2650_v10, %v3380_v22 }
 0xfab   : > { %v1812_v60 = vpop.permute.xlu0 %1811 }
 0xfac   : > { %v1814_v63 = vmul.f32 %v2646_v59, %v1812_v60 }
 0xfae   : > { %1816 = vrot.lane.b32.xlu0 %v1814_v63, %s2783_s30 }
 0xfb9   : > { %v1897_v11 = vpop.permute.xlu1 %1896 }
 0xfba   : > { %v1899_v12 = vmul.f32 %v2650_v10, %v1897_v11 }
 0xfbc   : > { %1901 = vrot.lane.b32.xlu1 %v1899_v12, %s2783_s30 }
0x1020   : > { %v1817_v15 = vpop.permute.xlu0 %1816 }
0x1021   : > { %v3485_v36 = vadd.f32 %v1817_v15, %v1809_v13 }
0x1023   : > { %2651 = vtanh.f32 %v3485_v36 }
0x102d   : > { %v2652_v17 = vpop.eup %2651 }
0x102e   : > { %1822 = vrot.lane.b32.xlu0 %v2652_v17, %s2783_s30  ;;  %v1902_v5 = vpop.permute.xlu1 %1901 }
0x102f   : > { %v3491_v6 = vadd.f32 %v1902_v5, %v1894_v33 }
0x1031   : > { %2653 = vtanh.f32 %v3491_v6 }
0x1032   : > { %2037 = vperm.xlu0 %2469, %v2418_v18   ;;  %2655 = vpow2.f32 %v2409_v20 }
0x103b   : > { %v2654_v7 = vpop.eup %2653 }
0x103c   : > { %1907 = vrot.lane.b32.xlu1 %v2654_v7, %s2783_s30  ;;  %v2656_v8 = vpop.eup %2655 }
0x103d   : > { %v1803_v24 = vadd.f32 1.0, %v2656_v8 }
0x103f   : > { %2657 = vrcp.f32 %v1803_v24 }
0x1040   : > { %2659 = vpow2.f32 %v2413_v50 }
0x1049   : > { %v2658_v28 = vpop.eup %2657 }
0x104a   : > { %v2660_v51 = vpop.eup %2659 }
0x104b   : > { %v1888_v52 = vadd.f32 1.0, %v2660_v51 }
0x104d   : > { %2661 = vrcp.f32 %v1888_v52 }
0x1057   : > { %v2662_v42 = vpop.eup %2661 }
0x10a0   : > { %v1823_v30 = vpop.permute.xlu0 %1822 }
0x10a1   : > { %v1825_v22 = vmul.f32 %v2658_v28, %v1823_v30 }
0x10a3   : > { %v1826_v44 = vpack.c.bf16 %v1825_v22, %v1825_v22 }
0x10a5   : > { %2414 = vmatmul.mubr.msk.bf16.vlgmr.msra.gmra.mrb[36].mxu1 %vm521_vm0, %v1826_v44 }
0x10a6   : > { %2045 = vmatpush1.bf16.msra.mxu1 %v3301_v16  ;;  %2076 = vmatprep.mubr.bf16.mxu1 %v2782_v9 }
0x10a7   : > { %2046 = vmatprep.subr.bf16.mxu1 %v3308_v4 }
0x10aa   : > { %2047 = vmatpush1.bf16.msra.mxu1 %v3314_v48 }
0x10ab   : > { %2048 = vmatprep.subr.bf16.mxu1 %v3320_v41 }
0x10ae   : > { %2049 = vmatpush1.bf16.msra.mxu1 %v3326_v46  ;;  %v1908_v14 = vpop.permute.xlu1 %1907 }
0x10af   : > { %2050 = vmatprep.subr.bf16.mxu1 %v3332_v19  ;;  %v1910_v53 = vmul.f32 %v2662_v42, %v1908_v14 }
0x10b1   : > { %v1911_v16 = vpack.c.bf16 %v1910_v53, %v1910_v53  ;;  %v2038_v46 = vpop.permute.xlu0 %2037 }
0x10b2   : > { %2051 = vmatpush1.bf16.msra.mxu1 %v3338_v25  ;;  %v2041_v19 = vmul.f32 %v2038_v46, %v2980_v23 }
0x10b3   : > { %2165 = vmatprep.subr.bf16.mxu1 %v3426_v43  ;;  %2415 = vmatmul.mubr.msk.bf16.vlgmr.msra.gmra.mrb[40].mxu0 %vm521_vm0, %v1911_v16 }
0x10b4   : > { %2122 = vmatpush1.bf16.msra.mxu0 %v3391_v1  ;;  %2153 = vmatprep.mubr.bf16.mxu0 %v2782_v9 }
0x10b5   : > { %2419 = vmatmul.mubr.msk.bf16.vlgmr.msra.gmra.mrb[40].mxu1 %vm521_vm0, %v1911_v16  ;;  %2123 = vmatprep.subr.bf16.mxu0 %v3396_v34  ;;  %v2043_v34 = vadd.f32 %v2041_v19, %v2987_v27  ;;  %v2040_v27 = vmul.f32 %v2038_v46, %v2998_v37 }
0x10b6   : > { %2166 = vmatpush1.bf16.msra.mxu1 %v3433_v45  ;;  %2197 = vmatprep.mubr.bf16.mxu1 %v2782_v9 }
0x10b7   : > { %2167 = vmatprep.subr.bf16.mxu1 %v3440_v49 }
0x10b8   : > { %2124 = vmatpush1.bf16.msra.mxu0 %v3402_v38 }
0x10b9   : > { %2125 = vmatprep.subr.bf16.mxu0 %v3405_v40 }
0x10ba   : > { %2168 = vmatpush1.bf16.msra.mxu1 %v3446_v47 }
0x10bb   : > { %2169 = vmatprep.subr.bf16.mxu1 %v3452_v21 }
0x10bc   : > { %2126 = vmatpush1.bf16.msra.mxu0 %v3410_v26 }
0x10bd   : > { %2127 = vmatprep.subr.bf16.mxu0 %v3413_v35 }
0x10be   : > { %2170 = vmatpush1.bf16.msra.mxu1 %v3458_v31 }
0x10bf   : > { %2171 = vmatprep.subr.bf16.mxu1 %v3464_v62  ;;  %v2042_v62 = vadd.f32 %v2040_v27, %v3002_v39 }
0x10c0   : > { %2128 = vmatpush1.bf16.msra.mxu0 %v3418_v2 }
0x10c2   : > { %2172 = vmatpush1.bf16.msra.mxu1 %v3470_v3 }
0x1178   : > { %v1949_v9 = vpop.f32.mrb[36].mxu1 }
0x1179   : > { %v1951_v4 = vpop.f32.mrb[37].mxu1 }
0x117a   : > { %v1953_v48 = vpop.f32.mrb[38].mxu1 }
0x117b   : > { %v1954_v41 = vpop.f32.mrb[39].mxu1 }
0x1186   : > { %v1993_v25 = vpop.f32.mrb[40].mxu0 }
0x1187   : > { %v1994_v38 = vadd.f32 %v1993_v25, %v1949_v9  ;;  %v1995_v40 = vpop.f32.mrb[41].mxu0 }
0x1188   : > { %v2078_v1 = vpop.f32.mrb[40].mxu1  ;;  %v1996_v35 = vadd.f32 %v1995_v40, %v1951_v4  ;;  %v1997_v43 = vpop.f32.mrb[42].mxu0 }
0x1189   : > { %v2080_v26 = vpop.f32.mrb[41].mxu1  ;;  %v1998_v49 = vpop.f32.mrb[43].mxu0  ;;  %v2085_v3 = vadd.f32 %v2078_v1, %v2042_v62  ;;  %v2000_v54 = vadd.f32 %v1994_v38, %v3128_v0 }
0x118a   : > { %v2086_v45 = vadd.f32 %v2080_v26, %v2043_v34  ;;  %v2082_v2 = vpop.f32.mrb[42].mxu1  ;;  %v2001_v21 = vadd.f32 %v1996_v35, %v3120_v32 }
0x118b   : > { %v2083_v47 = vpop.f32.mrb[43].mxu1  ;;  %v2420_v55 = vmul.f32 -1.442695, %v2085_v3  ;;  %v2416_v56 = vmul.f32 -1.442695, %v2000_v54 }
0x118c   : > { %2663 = vtanh.f32 %v2086_v45  ;;  %v2421_v7 = vmul.f32 -1.442695, %v2086_v45  ;;  %v2417_v20 = vmul.f32 -1.442695, %v2001_v21  ;;  %v2426_v3 = vld [vmem:[%s3570_s7] ss:$0 sm:$0xff] }
0x118d   : > { %2665 = vtanh.f32 %v2001_v21 }
0x118e   : > { %2667 = vpow2.f32 %v2420_v55 }
0x118f   : > { %2669 = vpow2.f32 %v2416_v56 }
0x1196   : > { %v2664_v31 = vpop.eup %2663 }
0x1197   : > { %2102 = vrot.lane.b32.xlu0 %v2664_v31, %s2783_s30  ;;  %v2666_v23 = vpop.eup %2665 }
0x1198   : > { %2017 = vrot.lane.b32.xlu1 %v2666_v23, %s2783_s30  ;;  %v2668_v57 = vpop.eup %2667 }
0x1199   : > { %v2670_v58 = vpop.eup %2669  ;;  %v2093_v59 = vadd.f32 1.0, %v2668_v57  ;;  %v2427_v57 = vld [vmem:[#allocation2] ss:$0 sm:$0xff] }
0x119a   : > { %v2008_v60 = vadd.f32 1.0, %v2670_v58 }
0x119b   : > { %2671 = vrcp.f32 %v2093_v59 }
0x119c   : > { %2673 = vrcp.f32 %v2008_v60 }
0x11a5   : > { %v2672_v61 = vpop.eup %2671 }
0x11a6   : > { %v2674_v10 = vpop.eup %2673  ;;  %v2100_v39 = vmul.f32 %v2672_v61, %v3491_v6 }
0x11a7   : > { %v2015_v15 = vmul.f32 %v2674_v10, %v3485_v36 }
0x1209   : > { %v2103_v63 = vpop.permute.xlu0 %2102 }
0x120a   : > { %v2105_v29 = vmul.f32 %v2672_v61, %v2103_v63  ;;  %v2018_v37 = vpop.permute.xlu1 %2017 }
0x120b   : > { %v2020_v11 = vmul.f32 %v2674_v10, %v2018_v37 }
0x120c   : > { %2107 = vrot.lane.b32.xlu0 %v2105_v29, %s2783_s30 }
0x120d   : > { %2022 = vrot.lane.b32.xlu1 %v2020_v11, %s2783_s30 }
0x127e   : > { %v2108_v12 = vpop.permute.xlu0 %2107 }
0x127f   : > { %v2110_v13 = vadd.f32 %v2108_v12, %v2100_v39  ;;  %v2023_v17 = vpop.permute.xlu1 %2022 }
0x1280   : > { %v2025_v18 = vadd.f32 %v2023_v17, %v2015_v15 }
0x1281   : > { %2675 = vtanh.f32 %v2110_v13 }
0x1282   : > { %2677 = vtanh.f32 %v2025_v18 }
0x1283   : > { %2679 = vpow2.f32 %v2421_v7 }
0x1284   : > { %2681 = vpow2.f32 %v2417_v20 }
0x128b   : > { %v2676_v33 = vpop.eup %2675 }
0x128c   : > { %2113 = vrot.lane.b32.xlu0 %v2676_v33, %s2783_s30  ;;  %v2678_v5 = vpop.eup %2677 }
0x128d   : > { %2028 = vrot.lane.b32.xlu1 %v2678_v5, %s2783_s30  ;;  %v2680_v8 = vpop.eup %2679 }
0x128e   : > { %v2682_v6 = vpop.eup %2681  ;;  %v2094_v24 = vadd.f32 1.0, %v2680_v8 }
0x128f   : > { %v2009_v50 = vadd.f32 1.0, %v2682_v6 }
0x1290   : > { %2683 = vrcp.f32 %v2094_v24 }
0x1291   : > { %2685 = vrcp.f32 %v2009_v50 }
0x129a   : > { %v2684_v36 = vpop.eup %2683 }
0x129b   : > { %v2686_v51 = vpop.eup %2685 }
0x12fe   : > { %v2114_v28 = vpop.permute.xlu0 %2113 }
0x12ff   : > { %v2116_v30 = vmul.f32 %v2684_v36, %v2114_v28  ;;  %v2029_v22 = vpop.permute.xlu1 %2028 }
0x1300   : > { %v2031_v52 = vmul.f32 %v2686_v51, %v2029_v22 }
0x1301   : > { %v2117_v44 = vpack.c.bf16 %v2116_v30, %v2116_v30 }
0x1302   : > { %v2032_v42 = vpack.c.bf16 %v2031_v52, %v2031_v52 }
0x1303   : > { %2423 = vmatmul.mubr.msk.bf16.vlgmr.msra.gmra.mrb[44].mxu1 %vm521_vm0, %v2117_v44 }
0x1304   : > { %2422 = vmatmul.mubr.msk.bf16.vlgmr.msra.gmra.mrb[44].mxu0 %vm521_vm0, %v2032_v42 }
0x13d6   : > { %v2199_v14 = vpop.f32.mrb[44].mxu1 }
0x13d7   : > { %v2201_v53 = vpop.f32.mrb[45].mxu1  ;;  %v2155_v16 = vpop.f32.mrb[44].mxu0 }
0x13d8   : > { %v2203_v9 = vpop.f32.mrb[46].mxu1  ;;  %v2200_v4 = vadd.f32 %v2199_v14, %v2155_v16  ;;  %v2157_v48 = vpop.f32.mrb[45].mxu0 }
0x13d9   : > { %v2204_v41 = vpop.f32.mrb[47].mxu1  ;;  %v2202_v46 = vadd.f32 %v2201_v53, %v2157_v48  ;;  %v2159_v19 = vpop.f32.mrb[46].mxu0 }
0x13da   : > { %v2160_v25 = vpop.f32.mrb[47].mxu0  ;;  %v2206_v38 = vadd.f32 %v2200_v4, %v3128_v0 }
0x13db   : > { %v2207_v1 = vadd.f32 %v2202_v46, %v3120_v32 }
0x13dc   : > { %v2424_v40 = vmul.f32 -1.442695, %v2206_v38 }
0x13dd   : > { %2687 = vtanh.f32 %v2207_v1  ;;  %v2425_v0 = vmul.f32 -1.442695, %v2207_v1 }
0x13de   : > { %2689 = vpow2.f32 %v2424_v40 }
0x13e7   : > { %v2688_v34 = vpop.eup %2687 }
0x13e8   : > { %2223 = vrot.lane.b32.xlu1 %v2688_v34, %s2783_s30  ;;  %v2690_v26 = vpop.eup %2689 }
0x13e9   : > { %v2214_v35 = vadd.f32 1.0, %v2690_v26 }
0x13eb   : > { %2691 = vrcp.f32 %v2214_v35 }
0x13f5   : > { %v2692_v43 = vpop.eup %2691 }
0x13f6   : > { %v2221_v49 = vmul.f32 %v2692_v43, %v2025_v18 }
0x145a   : > { %v2224_v45 = vpop.permute.xlu1 %2223 }
0x145b   : > { %v2226_v2 = vmul.f32 %v2692_v43, %v2224_v45 }
0x145d   : > { %2228 = vrot.lane.b32.xlu0 %v2226_v2, %s2783_s30 }
0x14cf   : > { %v2229_v47 = vpop.permute.xlu0 %2228 }
0x14d0   : > { %v2231_v21 = vadd.f32 %v2229_v47, %v2221_v49 }
0x14d2   : > { %2693 = vtanh.f32 %v2231_v21 }
0x14d3   : > { %2695 = vpow2.f32 %v2425_v0 }
0x14dc   : > { %v2694_v32 = vpop.eup %2693 }
0x14dd   : > { %2234 = vrot.lane.b32.xlu1 %v2694_v32, %s2783_s30  ;;  %v2696_v31 = vpop.eup %2695 }
0x14de   : > { %v2215_v23 = vadd.f32 1.0, %v2696_v31 }
0x14e0   : > { %2697 = vrcp.f32 %v2215_v23 }
0x14ea   : > { %v2698_v27 = vpop.eup %2697 }
0x154f   : > { %v2235_v62 = vpop.permute.xlu1 %2234 }
0x1550   : > { %v2237_v54 = vmul.f32 %v2698_v27, %v2235_v62 }
0x1552   : > { %v2245_v55 = vmul.f32 %v2426_v3, %v2237_v54 }
0x1554   : > { %v2246_v56 = vsel %vm521_vm0, %v2245_v55, 0.0 }
0x1555   : > { %2247 = vadd.xlane.f32.xlu0 %v2246_v56 }
0x15e2   : > { %v2248_v58 = vpop.xlane.xlu0 %2247 }
0x15e3   : > { %v2256_v59 = vadd.f32 %v2427_v57, %v2248_v58 }
0x15e5   : > { %2258 = vst.msk [vmem:[%s409_s24] sm:$0xff] %vm2257_vm1, %v2256_v59 }
0x15e6 PF: > { %p19_p11 = scmp.ge.s32.totalorder %s2856_s14, 4   ;;  %s3582_s11 = smov %s2773_s12 }
0x15e7   : > { %s3583_s12 = smov %s2866_s17  ;;  %s3584_s13 = smov %s2856_s14 }
0x15e8   :  { %21 = sbr.rel (!%p19_p11) target bundleno = 5 (0x5), region = 141 }
0x15ef   :  { %2278 = vsyncpa [#allocation5], 1 }
0x15f0   :  { %2280 = vsyncpa [#allocation5 + $0x1], 1 }

</bundles_post_ra>
